<compile_context>
chip_gen: v5e
topology: v5e:2x2
jax: 0.10.0
libtpu: 0.0.40
codegen_flags: <defaults>
</compile_context>

<pallas_src>
from functools import partial

import jax
import jax.numpy as jnp
from jax.experimental import pallas as pl
from jax.experimental.pallas import tpu as pltpu

DIM_IN = 2
DIM_OUT = 1
DIM_HIDDEN = 10
HIDDEN_LAYERS = 8
NUM_LAYERS = HIDDEN_LAYERS + 1      # 9 Linear layers total
PAD = 16                            # padded hidden feature width (sublane-aligned)
PAD_OUT = 8                         # padded output rows for the last layer slab


def _sigmoid(v):
    # single EUP transcendental instead of exp + divide
    return 0.5 * jnp.tanh(0.5 * v) + 0.5


def _dnn_kernel(x_ref, w0_ref, wr_ref, wlast_ref, b_ref, out_ref):
    """Whole MLP on one feature-major batch tile (all data resident in VMEM).

    x_ref    : (DIM_IN, bt) f32        input tile, batch on the lane axis
    w0_ref   : (PAD, DIM_IN) bf16      first-layer weight, rows >= 10 zero
    wr_ref   : (NUM_LAYERS-2, PAD, PAD) bf16   hidden layers 1..7, zero-padded
    wlast_ref: (PAD_OUT, PAD) bf16     last layer, row 0 = the real 1x10 row
    b_ref    : (NUM_LAYERS, PAD, 1) f32 biases, zero-padded
    out_ref  : (DIM_OUT, bt) f32       lane-dense output tile
    """
    # layer 0: (PAD, DIM_IN) @ (DIM_IN, bt) -> (PAD, bt), bf16 MXU, f32 acc
    h = jnp.dot(w0_ref[...], x_ref[...].astype(jnp.bfloat16),
                preferred_element_type=jnp.float32)
    h = _sigmoid(h + b_ref[0])

    # hidden layers 1..7: uniform (PAD, PAD) @ (PAD, bt), bf16 MXU, f32 acc
    for layer in range(1, NUM_LAYERS - 1):
        h = jnp.dot(wr_ref[layer - 1], h.astype(jnp.bfloat16),
                    preferred_element_type=jnp.float32) + b_ref[layer]
        h = _sigmoid(h)

    # final layer: only PAD_OUT output rows, no activation
    y = jnp.dot(wlast_ref[...], h.astype(jnp.bfloat16),
                preferred_element_type=jnp.float32)
    y = y + b_ref[NUM_LAYERS - 1][:PAD_OUT]
    out_ref[...] = y[:DIM_OUT, :]


def pack_params(weights, biases):
    """Pack PyTorch-layout params into 4 zero-padded slabs (runs ONCE at init).

    weights[i]: (out_i, in_i) float32 ; biases[i]: (out_i,) float32
    Matmul operands are stored as bf16 (MXU-native); biases stay f32.
    """
    w0 = jnp.zeros((PAD, DIM_IN), jnp.float32)
    w0 = w0.at[: weights[0].shape[0], :].set(weights[0])

    wr = jnp.zeros((NUM_LAYERS - 2, PAD, PAD), jnp.float32)
    for l in range(1, NUM_LAYERS - 1):
        o, i = weights[l].shape
        wr = wr.at[l - 1, :o, :i].set(weights[l])

    wlast = jnp.zeros((PAD_OUT, PAD), jnp.float32)
    o, i = weights[NUM_LAYERS - 1].shape
    wlast = wlast.at[:o, :i].set(weights[NUM_LAYERS - 1])

    bs = jnp.zeros((NUM_LAYERS, PAD, 1), jnp.float32)
    for l in range(NUM_LAYERS):
        bs = bs.at[l, : biases[l].shape[0], 0].set(biases[l])

    return (w0.astype(jnp.bfloat16), wr.astype(jnp.bfloat16),
            wlast.astype(jnp.bfloat16), bs)


@partial(jax.jit, static_argnames=("batch_tile",))
def dnn_forward(x, w0, wr, wlast, bs, *, batch_tile=1024):
    """x: (N, DIM_IN) float32 (PyTorch row-major). Returns (N, DIM_OUT) float32.

    Pass in the slabs from pack_params(); the whole wrapper (pad/transpose +
    pallas_call + un-pad) is one jitted XLA program.
    """
    n = x.shape[0]
    n_pad = pl.cdiv(n, batch_tile) * batch_tile
    grid = (n_pad // batch_tile,)

    # feature-major input: (DIM_IN, n_pad), padded batch columns are zeros
    x_fm = jnp.zeros((DIM_IN, n_pad), jnp.float32).at[:, :n].set(x.T)

    out_fm = pl.pallas_call(
        _dnn_kernel,
        out_shape=jax.ShapeDtypeStruct((DIM_OUT, n_pad), jnp.float32),
        grid_spec=pltpu.PrefetchScalarGridSpec(
            num_scalar_prefetch=0,
            grid=grid,
            in_specs=[
                pl.BlockSpec((DIM_IN, batch_tile), lambda i: (0, i)),
                pl.BlockSpec((PAD, DIM_IN), lambda i: (0, 0)),
                pl.BlockSpec((NUM_LAYERS - 2, PAD, PAD), lambda i: (0, 0, 0)),
                pl.BlockSpec((PAD_OUT, PAD), lambda i: (0, 0)),
                pl.BlockSpec((NUM_LAYERS, PAD, 1), lambda i: (0, 0, 0)),
            ],
            out_specs=pl.BlockSpec((DIM_OUT, batch_tile), lambda i: (0, i)),
        ),
        compiler_params=pltpu.CompilerParams(
            dimension_semantics=("parallel",)),
    )(x_fm, w0, wr, wlast, bs)

    # back to PyTorch layout (layout plumbing only, fused into the same jit)
    return out_fm[:, :n].T


def init_params(key):
    """xavier_normal weights (PyTorch layout (out,in)); PyTorch-default-style biases."""
    dims = [DIM_IN] + [DIM_HIDDEN] * HIDDEN_LAYERS + [DIM_OUT]
    weights, biases = [], []
    for layer in range(NUM_LAYERS):
        fan_in, fan_out = dims[layer], dims[layer + 1]
        key, wk, bk = jax.random.split(key, 3)
        std = (2.0 / (fan_in + fan_out)) ** 0.5
        w = std * jax.random.normal(wk, (fan_out, fan_in), dtype=jnp.float32)
        bound = 1.0 / (fan_in ** 0.5)
        b = jax.random.uniform(bk, (fan_out,), jnp.float32, -bound, bound)
        weights.append(w)
        biases.append(b)
    return weights, biases


def reference_forward(x, weights, biases):
    h = x
    for layer in range(NUM_LAYERS):
        h = h @ weights[layer].T + biases[layer]
        if layer < NUM_LAYERS - 1:
            h = jax.nn.sigmoid(h)
    return h


if __name__ == "__main__":
    key = jax.random.PRNGKey(0)
    key, xk = jax.random.split(key)

    N = 2048                # (t, x) collocation points; grid = 2 (even, for v7x's 2 TCs)
    BATCH_TILE = 1024
    x = jax.random.normal(xk, (N, DIM_IN), dtype=jnp.float32)

    weights, biases = init_params(key)
    w0, wr, wlast, bs = pack_params(weights, biases)   # hoisted: packed once

    out = dnn_forward(x, w0, wr, wlast, bs, batch_tile=BATCH_TILE)
    out = jax.block_until_ready(out)

    ref = reference_forward(x, weights, biases)
    assert out.shape == (N, DIM_OUT)
    # bf16 MXU inputs -> looser tolerance than the f32 baseline
    assert jnp.allclose(out, ref, atol=2e-2, rtol=2e-2), float(jnp.max(jnp.abs(out - ref)))

    # TODO(synk): PINN_Burgers.forward's PDE-residual branch needs autograd
    # (u_t, u_x, u_xx); only the plain DNN forward is implemented as a kernel.
    print("KERNEL_OK")
</pallas_src>

<mosaic_0001>
module attributes {stable_mosaic.version = 11 : i64} {
  func.func @_dnn_kernel(%arg0: i32, %arg1: memref<2x1024xf32, #tpu.memory_space<vmem>>, %arg2: memref<16x2xbf16, #tpu.memory_space<vmem>>, %arg3: memref<7x16x16xbf16, #tpu.memory_space<vmem>>, %arg4: memref<8x16xbf16, #tpu.memory_space<vmem>>, %arg5: memref<9x16x1xf32, #tpu.memory_space<vmem>>, %arg6: memref<1x1024xf32, #tpu.memory_space<vmem>>) attributes {dimension_semantics = [#tpu.dimension_semantics<parallel>], iteration_bounds = array<i64: 2>, scalar_prefetch = 0 : i64, scratch_operands = 0 : i64, tpu.core_type = #tpu.core_type<tc>, window_params = [{transform_indices = @transform_0, window_bounds = array<i64: 2, 1024>}, {pipeline_mode = #tpu.pipeline_mode<synchronous>, transform_indices = @transform_1, window_bounds = array<i64: 16, 2>}, {pipeline_mode = #tpu.pipeline_mode<synchronous>, transform_indices = @transform_2, window_bounds = array<i64: 7, 16, 16>}, {pipeline_mode = #tpu.pipeline_mode<synchronous>, transform_indices = @transform_3, window_bounds = array<i64: 8, 16>}, {pipeline_mode = #tpu.pipeline_mode<synchronous>, transform_indices = @transform_4, window_bounds = array<i64: 9, 16, 1>}, {transform_indices = @transform_5, window_bounds = array<i64: 1, 1024>}]} {
    %c0 = arith.constant 0 : index
    %c0_0 = arith.constant 0 : index
    %0 = vector.load %arg2[%c0, %c0_0] : memref<16x2xbf16, #tpu.memory_space<vmem>>, vector<16x2xbf16>
    %c0_1 = arith.constant 0 : index
    %c0_2 = arith.constant 0 : index
    %1 = vector.load %arg1[%c0_1, %c0_2] : memref<2x1024xf32, #tpu.memory_space<vmem>>, vector<2x1024xf32>
    %2 = arith.truncf %1 : vector<2x1024xf32> to vector<2x1024xbf16>
    %cst = arith.constant dense<0.000000e+00> : vector<16x1024xf32>
    %3 = tpu.matmul %0, %2, %cst {dimension_numbers = #tpu.dot_dimension_numbers<[1], [0], [0], [1], [0, 0, 1, 1], [], []>} : vector<16x2xbf16>, vector<2x1024xbf16>, vector<16x1024xf32> -> vector<16x1024xf32>
    %c0_3 = arith.constant 0 : index
    %c0_4 = arith.constant 0 : index
    %c0_5 = arith.constant 0 : index
    %4 = vector.load %arg5[%c0_3, %c0_4, %c0_5] : memref<9x16x1xf32, #tpu.memory_space<vmem>>, vector<1x16x1xf32>
    %5 = vector.shape_cast %4 : vector<1x16x1xf32> to vector<16x1xf32>
    %6 = vector.broadcast %5 : vector<16x1xf32> to vector<16x1024xf32>
    %7 = arith.addf %3, %6 : vector<16x1024xf32>
    %cst_6 = arith.constant 5.000000e-01 : f32
    %8 = vector.broadcast %cst_6 : f32 to vector<16x1024xf32>
    %9 = arith.mulf %8, %7 : vector<16x1024xf32>
    %10 = math.tanh %9 : vector<16x1024xf32>
    %cst_7 = arith.constant 5.000000e-01 : f32
    %11 = vector.broadcast %cst_7 : f32 to vector<16x1024xf32>
    %12 = arith.mulf %11, %10 : vector<16x1024xf32>
    %cst_8 = arith.constant 5.000000e-01 : f32
    %13 = vector.broadcast %cst_8 : f32 to vector<16x1024xf32>
    %14 = arith.addf %12, %13 : vector<16x1024xf32>
    %c0_9 = arith.constant 0 : index
    %c0_10 = arith.constant 0 : index
    %c0_11 = arith.constant 0 : index
    %15 = vector.load %arg3[%c0_9, %c0_10, %c0_11] : memref<7x16x16xbf16, #tpu.memory_space<vmem>>, vector<1x16x16xbf16>
    %16 = vector.shape_cast %15 : vector<1x16x16xbf16> to vector<16x16xbf16>
    %17 = arith.truncf %14 : vector<16x1024xf32> to vector<16x1024xbf16>
    %cst_12 = arith.constant dense<0.000000e+00> : vector<16x1024xf32>
    %18 = tpu.matmul %16, %17, %cst_12 {dimension_numbers = #tpu.dot_dimension_numbers<[1], [0], [0], [1], [0, 0, 1, 1], [], []>} : vector<16x16xbf16>, vector<16x1024xbf16>, vector<16x1024xf32> -> vector<16x1024xf32>
    %c1 = arith.constant 1 : index
    %c0_13 = arith.constant 0 : index
    %c0_14 = arith.constant 0 : index
    %19 = vector.load %arg5[%c1, %c0_13, %c0_14] : memref<9x16x1xf32, #tpu.memory_space<vmem>>, vector<1x16x1xf32>
    %20 = vector.shape_cast %19 : vector<1x16x1xf32> to vector<16x1xf32>
    %21 = vector.broadcast %20 : vector<16x1xf32> to vector<16x1024xf32>
    %22 = arith.addf %18, %21 : vector<16x1024xf32>
    %cst_15 = arith.constant 5.000000e-01 : f32
    %23 = vector.broadcast %cst_15 : f32 to vector<16x1024xf32>
    %24 = arith.mulf %23, %22 : vector<16x1024xf32>
    %25 = math.tanh %24 : vector<16x1024xf32>
    %cst_16 = arith.constant 5.000000e-01 : f32
    %26 = vector.broadcast %cst_16 : f32 to vector<16x1024xf32>
    %27 = arith.mulf %26, %25 : vector<16x1024xf32>
    %cst_17 = arith.constant 5.000000e-01 : f32
    %28 = vector.broadcast %cst_17 : f32 to vector<16x1024xf32>
    %29 = arith.addf %27, %28 : vector<16x1024xf32>
    %c1_18 = arith.constant 1 : index
    %c0_19 = arith.constant 0 : index
    %c0_20 = arith.constant 0 : index
    %30 = vector.load %arg3[%c1_18, %c0_19, %c0_20] : memref<7x16x16xbf16, #tpu.memory_space<vmem>>, vector<1x16x16xbf16>
    %31 = vector.shape_cast %30 : vector<1x16x16xbf16> to vector<16x16xbf16>
    %32 = arith.truncf %29 : vector<16x1024xf32> to vector<16x1024xbf16>
    %cst_21 = arith.constant dense<0.000000e+00> : vector<16x1024xf32>
    %33 = tpu.matmul %31, %32, %cst_21 {dimension_numbers = #tpu.dot_dimension_numbers<[1], [0], [0], [1], [0, 0, 1, 1], [], []>} : vector<16x16xbf16>, vector<16x1024xbf16>, vector<16x1024xf32> -> vector<16x1024xf32>
    %c2 = arith.constant 2 : index
    %c0_22 = arith.constant 0 : index
    %c0_23 = arith.constant 0 : index
    %34 = vector.load %arg5[%c2, %c0_22, %c0_23] : memref<9x16x1xf32, #tpu.memory_space<vmem>>, vector<1x16x1xf32>
    %35 = vector.shape_cast %34 : vector<1x16x1xf32> to vector<16x1xf32>
    %36 = vector.broadcast %35 : vector<16x1xf32> to vector<16x1024xf32>
    %37 = arith.addf %33, %36 : vector<16x1024xf32>
    %cst_24 = arith.constant 5.000000e-01 : f32
    %38 = vector.broadcast %cst_24 : f32 to vector<16x1024xf32>
    %39 = arith.mulf %38, %37 : vector<16x1024xf32>
    %40 = math.tanh %39 : vector<16x1024xf32>
    %cst_25 = arith.constant 5.000000e-01 : f32
    %41 = vector.broadcast %cst_25 : f32 to vector<16x1024xf32>
    %42 = arith.mulf %41, %40 : vector<16x1024xf32>
    %cst_26 = arith.constant 5.000000e-01 : f32
    %43 = vector.broadcast %cst_26 : f32 to vector<16x1024xf32>
    %44 = arith.addf %42, %43 : vector<16x1024xf32>
    %c2_27 = arith.constant 2 : index
    %c0_28 = arith.constant 0 : index
    %c0_29 = arith.constant 0 : index
    %45 = vector.load %arg3[%c2_27, %c0_28, %c0_29] : memref<7x16x16xbf16, #tpu.memory_space<vmem>>, vector<1x16x16xbf16>
    %46 = vector.shape_cast %45 : vector<1x16x16xbf16> to vector<16x16xbf16>
    %47 = arith.truncf %44 : vector<16x1024xf32> to vector<16x1024xbf16>
    %cst_30 = arith.constant dense<0.000000e+00> : vector<16x1024xf32>
    %48 = tpu.matmul %46, %47, %cst_30 {dimension_numbers = #tpu.dot_dimension_numbers<[1], [0], [0], [1], [0, 0, 1, 1], [], []>} : vector<16x16xbf16>, vector<16x1024xbf16>, vector<16x1024xf32> -> vector<16x1024xf32>
    %c3 = arith.constant 3 : index
    %c0_31 = arith.constant 0 : index
    %c0_32 = arith.constant 0 : index
    %49 = vector.load %arg5[%c3, %c0_31, %c0_32] : memref<9x16x1xf32, #tpu.memory_space<vmem>>, vector<1x16x1xf32>
    %50 = vector.shape_cast %49 : vector<1x16x1xf32> to vector<16x1xf32>
    %51 = vector.broadcast %50 : vector<16x1xf32> to vector<16x1024xf32>
    %52 = arith.addf %48, %51 : vector<16x1024xf32>
    %cst_33 = arith.constant 5.000000e-01 : f32
    %53 = vector.broadcast %cst_33 : f32 to vector<16x1024xf32>
    %54 = arith.mulf %53, %52 : vector<16x1024xf32>
    %55 = math.tanh %54 : vector<16x1024xf32>
    %cst_34 = arith.constant 5.000000e-01 : f32
    %56 = vector.broadcast %cst_34 : f32 to vector<16x1024xf32>
    %57 = arith.mulf %56, %55 : vector<16x1024xf32>
    %cst_35 = arith.constant 5.000000e-01 : f32
    %58 = vector.broadcast %cst_35 : f32 to vector<16x1024xf32>
    %59 = arith.addf %57, %58 : vector<16x1024xf32>
    %c3_36 = arith.constant 3 : index
    %c0_37 = arith.constant 0 : index
    %c0_38 = arith.constant 0 : index
    %60 = vector.load %arg3[%c3_36, %c0_37, %c0_38] : memref<7x16x16xbf16, #tpu.memory_space<vmem>>, vector<1x16x16xbf16>
    %61 = vector.shape_cast %60 : vector<1x16x16xbf16> to vector<16x16xbf16>
    %62 = arith.truncf %59 : vector<16x1024xf32> to vector<16x1024xbf16>
    %cst_39 = arith.constant dense<0.000000e+00> : vector<16x1024xf32>
    %63 = tpu.matmul %61, %62, %cst_39 {dimension_numbers = #tpu.dot_dimension_numbers<[1], [0], [0], [1], [0, 0, 1, 1], [], []>} : vector<16x16xbf16>, vector<16x1024xbf16>, vector<16x1024xf32> -> vector<16x1024xf32>
    %c4 = arith.constant 4 : index
    %c0_40 = arith.constant 0 : index
    %c0_41 = arith.constant 0 : index
    %64 = vector.load %arg5[%c4, %c0_40, %c0_41] : memref<9x16x1xf32, #tpu.memory_space<vmem>>, vector<1x16x1xf32>
    %65 = vector.shape_cast %64 : vector<1x16x1xf32> to vector<16x1xf32>
    %66 = vector.broadcast %65 : vector<16x1xf32> to vector<16x1024xf32>
    %67 = arith.addf %63, %66 : vector<16x1024xf32>
    %cst_42 = arith.constant 5.000000e-01 : f32
    %68 = vector.broadcast %cst_42 : f32 to vector<16x1024xf32>
    %69 = arith.mulf %68, %67 : vector<16x1024xf32>
    %70 = math.tanh %69 : vector<16x1024xf32>
    %cst_43 = arith.constant 5.000000e-01 : f32
    %71 = vector.broadcast %cst_43 : f32 to vector<16x1024xf32>
    %72 = arith.mulf %71, %70 : vector<16x1024xf32>
    %cst_44 = arith.constant 5.000000e-01 : f32
    %73 = vector.broadcast %cst_44 : f32 to vector<16x1024xf32>
    %74 = arith.addf %72, %73 : vector<16x1024xf32>
    %c4_45 = arith.constant 4 : index
    %c0_46 = arith.constant 0 : index
    %c0_47 = arith.constant 0 : index
    %75 = vector.load %arg3[%c4_45, %c0_46, %c0_47] : memref<7x16x16xbf16, #tpu.memory_space<vmem>>, vector<1x16x16xbf16>
    %76 = vector.shape_cast %75 : vector<1x16x16xbf16> to vector<16x16xbf16>
    %77 = arith.truncf %74 : vector<16x1024xf32> to vector<16x1024xbf16>
    %cst_48 = arith.constant dense<0.000000e+00> : vector<16x1024xf32>
    %78 = tpu.matmul %76, %77, %cst_48 {dimension_numbers = #tpu.dot_dimension_numbers<[1], [0], [0], [1], [0, 0, 1, 1], [], []>} : vector<16x16xbf16>, vector<16x1024xbf16>, vector<16x1024xf32> -> vector<16x1024xf32>
    %c5 = arith.constant 5 : index
    %c0_49 = arith.constant 0 : index
    %c0_50 = arith.constant 0 : index
    %79 = vector.load %arg5[%c5, %c0_49, %c0_50] : memref<9x16x1xf32, #tpu.memory_space<vmem>>, vector<1x16x1xf32>
    %80 = vector.shape_cast %79 : vector<1x16x1xf32> to vector<16x1xf32>
    %81 = vector.broadcast %80 : vector<16x1xf32> to vector<16x1024xf32>
    %82 = arith.addf %78, %81 : vector<16x1024xf32>
    %cst_51 = arith.constant 5.000000e-01 : f32
    %83 = vector.broadcast %cst_51 : f32 to vector<16x1024xf32>
    %84 = arith.mulf %83, %82 : vector<16x1024xf32>
    %85 = math.tanh %84 : vector<16x1024xf32>
    %cst_52 = arith.constant 5.000000e-01 : f32
    %86 = vector.broadcast %cst_52 : f32 to vector<16x1024xf32>
    %87 = arith.mulf %86, %85 : vector<16x1024xf32>
    %cst_53 = arith.constant 5.000000e-01 : f32
    %88 = vector.broadcast %cst_53 : f32 to vector<16x1024xf32>
    %89 = arith.addf %87, %88 : vector<16x1024xf32>
    %c5_54 = arith.constant 5 : index
    %c0_55 = arith.constant 0 : index
    %c0_56 = arith.constant 0 : index
    %90 = vector.load %arg3[%c5_54, %c0_55, %c0_56] : memref<7x16x16xbf16, #tpu.memory_space<vmem>>, vector<1x16x16xbf16>
    %91 = vector.shape_cast %90 : vector<1x16x16xbf16> to vector<16x16xbf16>
    %92 = arith.truncf %89 : vector<16x1024xf32> to vector<16x1024xbf16>
    %cst_57 = arith.constant dense<0.000000e+00> : vector<16x1024xf32>
    %93 = tpu.matmul %91, %92, %cst_57 {dimension_numbers = #tpu.dot_dimension_numbers<[1], [0], [0], [1], [0, 0, 1, 1], [], []>} : vector<16x16xbf16>, vector<16x1024xbf16>, vector<16x1024xf32> -> vector<16x1024xf32>
    %c6 = arith.constant 6 : index
    %c0_58 = arith.constant 0 : index
    %c0_59 = arith.constant 0 : index
    %94 = vector.load %arg5[%c6, %c0_58, %c0_59] : memref<9x16x1xf32, #tpu.memory_space<vmem>>, vector<1x16x1xf32>
    %95 = vector.shape_cast %94 : vector<1x16x1xf32> to vector<16x1xf32>
    %96 = vector.broadcast %95 : vector<16x1xf32> to vector<16x1024xf32>
    %97 = arith.addf %93, %96 : vector<16x1024xf32>
    %cst_60 = arith.constant 5.000000e-01 : f32
    %98 = vector.broadcast %cst_60 : f32 to vector<16x1024xf32>
    %99 = arith.mulf %98, %97 : vector<16x1024xf32>
    %100 = math.tanh %99 : vector<16x1024xf32>
    %cst_61 = arith.constant 5.000000e-01 : f32
    %101 = vector.broadcast %cst_61 : f32 to vector<16x1024xf32>
    %102 = arith.mulf %101, %100 : vector<16x1024xf32>
    %cst_62 = arith.constant 5.000000e-01 : f32
    %103 = vector.broadcast %cst_62 : f32 to vector<16x1024xf32>
    %104 = arith.addf %102, %103 : vector<16x1024xf32>
    %c6_63 = arith.constant 6 : index
    %c0_64 = arith.constant 0 : index
    %c0_65 = arith.constant 0 : index
    %105 = vector.load %arg3[%c6_63, %c0_64, %c0_65] : memref<7x16x16xbf16, #tpu.memory_space<vmem>>, vector<1x16x16xbf16>
    %106 = vector.shape_cast %105 : vector<1x16x16xbf16> to vector<16x16xbf16>
    %107 = arith.truncf %104 : vector<16x1024xf32> to vector<16x1024xbf16>
    %cst_66 = arith.constant dense<0.000000e+00> : vector<16x1024xf32>
    %108 = tpu.matmul %106, %107, %cst_66 {dimension_numbers = #tpu.dot_dimension_numbers<[1], [0], [0], [1], [0, 0, 1, 1], [], []>} : vector<16x16xbf16>, vector<16x1024xbf16>, vector<16x1024xf32> -> vector<16x1024xf32>
    %c7 = arith.constant 7 : index
    %c0_67 = arith.constant 0 : index
    %c0_68 = arith.constant 0 : index
    %109 = vector.load %arg5[%c7, %c0_67, %c0_68] : memref<9x16x1xf32, #tpu.memory_space<vmem>>, vector<1x16x1xf32>
    %110 = vector.shape_cast %109 : vector<1x16x1xf32> to vector<16x1xf32>
    %111 = vector.broadcast %110 : vector<16x1xf32> to vector<16x1024xf32>
    %112 = arith.addf %108, %111 : vector<16x1024xf32>
    %cst_69 = arith.constant 5.000000e-01 : f32
    %113 = vector.broadcast %cst_69 : f32 to vector<16x1024xf32>
    %114 = arith.mulf %113, %112 : vector<16x1024xf32>
    %115 = math.tanh %114 : vector<16x1024xf32>
    %cst_70 = arith.constant 5.000000e-01 : f32
    %116 = vector.broadcast %cst_70 : f32 to vector<16x1024xf32>
    %117 = arith.mulf %116, %115 : vector<16x1024xf32>
    %cst_71 = arith.constant 5.000000e-01 : f32
    %118 = vector.broadcast %cst_71 : f32 to vector<16x1024xf32>
    %119 = arith.addf %117, %118 : vector<16x1024xf32>
    %c0_72 = arith.constant 0 : index
    %c0_73 = arith.constant 0 : index
    %120 = vector.load %arg4[%c0_72, %c0_73] : memref<8x16xbf16, #tpu.memory_space<vmem>>, vector<8x16xbf16>
    %121 = arith.truncf %119 : vector<16x1024xf32> to vector<16x1024xbf16>
    %cst_74 = arith.constant dense<0.000000e+00> : vector<8x1024xf32>
    %122 = tpu.matmul %120, %121, %cst_74 {dimension_numbers = #tpu.dot_dimension_numbers<[1], [0], [0], [1], [0, 0, 1, 1], [], []>} : vector<8x16xbf16>, vector<16x1024xbf16>, vector<8x1024xf32> -> vector<8x1024xf32>
    %c8 = arith.constant 8 : index
    %c0_75 = arith.constant 0 : index
    %c0_76 = arith.constant 0 : index
    %123 = vector.load %arg5[%c8, %c0_75, %c0_76] : memref<9x16x1xf32, #tpu.memory_space<vmem>>, vector<1x16x1xf32>
    %124 = vector.shape_cast %123 : vector<1x16x1xf32> to vector<16x1xf32>
    %125 = vector.extract_strided_slice %124 {offsets = [0, 0], sizes = [8, 1], strides = [1, 1]} : vector<16x1xf32> to vector<8x1xf32>
    %126 = vector.broadcast %125 : vector<8x1xf32> to vector<8x1024xf32>
    %127 = arith.addf %122, %126 : vector<8x1024xf32>
    %128 = vector.extract_strided_slice %127 {offsets = [0, 0], sizes = [1, 1024], strides = [1, 1]} : vector<8x1024xf32> to vector<1x1024xf32>
    %c0_77 = arith.constant 0 : index
    %c0_78 = arith.constant 0 : index
    %129 = vector.load %arg6[%c0_77, %c0_78] : memref<1x1024xf32, #tpu.memory_space<vmem>>, vector<1x1024xf32>
    tpu.vector_store %arg6[%c0_77, %c0_78], %128 {strides = array<i32>} : memref<1x1024xf32, #tpu.memory_space<vmem>>, vector<1x1024xf32>,
    return
  }
  func.func @transform_0(%arg0: i32) -> (i32, i32) {
    %c0_i32 = arith.constant 0 : i32
    %c0_i32_0 = arith.constant 0 : i32
    return %c0_i32, %arg0 : i32, i32
  }
  func.func @transform_1(%arg0: i32) -> (i32, i32) {
    %c0_i32 = arith.constant 0 : i32
    %c0_i32_0 = arith.constant 0 : i32
    %c0_i32_1 = arith.constant 0 : i32
    return %c0_i32, %c0_i32_0 : i32, i32
  }
  func.func @transform_2(%arg0: i32) -> (i32, i32, i32) {
    %c0_i32 = arith.constant 0 : i32
    %c0_i32_0 = arith.constant 0 : i32
    %c0_i32_1 = arith.constant 0 : i32
    %c0_i32_2 = arith.constant 0 : i32
    return %c0_i32, %c0_i32_0, %c0_i32_1 : i32, i32, i32
  }
  func.func @transform_3(%arg0: i32) -> (i32, i32) {
    %c0_i32 = arith.constant 0 : i32
    %c0_i32_0 = arith.constant 0 : i32
    %c0_i32_1 = arith.constant 0 : i32
    return %c0_i32, %c0_i32_0 : i32, i32
  }
  func.func @transform_4(%arg0: i32) -> (i32, i32, i32) {
    %c0_i32 = arith.constant 0 : i32
    %c0_i32_0 = arith.constant 0 : i32
    %c0_i32_1 = arith.constant 0 : i32
    %c0_i32_2 = arith.constant 0 : i32
    return %c0_i32, %c0_i32_0, %c0_i32_1 : i32, i32, i32
  }
  func.func @transform_5(%arg0: i32) -> (i32, i32) {
    %c0_i32 = arith.constant 0 : i32
    %c0_i32_0 = arith.constant 0 : i32
    return %c0_i32, %arg0 : i32, i32
  }
}

</mosaic_0001>

<bundles_post_ra>
// kernel: dnn_forward.1
= control target key start
LH: loop header
LB: loop body
LE: loop exit
PB: predicated region body
PF: predicated region fallthrough
CT: control target
= control target key end

     0   :  { %10 = vsyncpa [#allocation3], 0  ;;  %s3200_s0 = inlined_call_operand.vmem [shape: f32[2,2048], index: 0, kind: input, shape index: {}]   ;;  %s3201_s1 = inlined_call_operand.vmem [shape: bf16[16,2], index: 1, kind: input, shape index: {}]   ;;  %s3202_s2 = inlined_call_operand.vmem [shape: bf16[7,16,16], index: 2, kind: input, shape index: {}]   ;;  %s3203_s3 = inlined_call_operand.vmem [shape: bf16[8,16], index: 3, kind: input, shape index: {}]   ;;  %s3204_s4 = inlined_call_operand.vmem [shape: f32[9,16,1], index: 4, kind: input, shape index: {}]   ;;  %s3205_s5 = inlined_call_operand.hbm [shape: f32[1,2048], index: 5, kind: output, shape index: {}]  }
   0x1   :  { %12 = vsyncpa [#allocation3 + $0x1], 0  ;;  %s2710_s18 = smov 0   ;;  %s2712_s19 = smov 0  }
   0x2   :  { %s2714_s20 = smov 0   ;;  %s2716_s21 = smov 0  }
   0x3 LB: > { %s2165_s22 = sadd.s32 4294967295, %s2677_s21   ;;  %s2166_s23 = sadd.s32 4294967294, %s2677_s21   ;;  %s2677_s21 = sphi %s2716_s21, %s3211_s21   ;;  %s2673_s20 = sphi %s2714_s20, %s3210_s20   ;;  %s2669_s19 = sphi %s2712_s19, %s3209_s19   ;;  %s2665_s18 = sphi %s2710_s18, %s3208_s18  }
   0x4   : > { %s2733_s24 = sadd.s32 1, %s2677_s21   ;;  %s135_s25 = sadd.s32 1, %s2673_s20 }
   0x5   : > { %s132_s26 = ssub.s32 %s2677_s21, %s2733_s24  ;;  %p145_p0 = scmp.ne.s32.totalorder %s2673_s20, %s2669_s19 }
   0x6   : > { %p133_p1 = scmp.eq.s32.totalorder %s132_s26, 0  ;;  %p146_p2 = scmp.eq.s32.totalorder %s2165_s22, 1 }
   0x7   : > { %p151_p3 = scmp.ne.s32.totalorder %s2669_s19, %s2665_s18  ;;  %p152_p4 = scmp.eq.s32.totalorder %s2166_s23, 1 }
   0x8   : > { %s2743_s27 = scalar_select %p133_p1, %s2673_s20, %s135_s25  }
   0x9   : > { %p2745_p5 = por %p146_p2, %p145_p0  ;;  %p2749_p6 = por %p152_p4, %p151_p3 }
   0xa   : > { %p2169_p7 = scmp.ge.s32.totalorder %s2677_s21, 1  ;;  %p191_p8 = scmp.lt.s32.totalorder %s2677_s21, 3 }
   0xc   : > { %p192_p9 = pnand %p2169_p7, %p191_p8 }
   0xd   : > { %s2758_s7 = sshll.u32 (!%p192_p9), %s2165_s22, 3  ;;  %s216_s15 = sand.u32 (!%p192_p9), 1, %s2669_s19  }
   0xe   : > { %195 = sbr.rel (%p192_p9) target bundleno = 1479 (0x5c7), region = 40  ;;  %p220_p10 = scmp.lt.s32.totalorder (!%p192_p9), %s2758_s7, 15 }
   0xf   : > { %s3164_s16 = sshll.u32 (!%p192_p9), %s216_s15, 3  ;;  %s2102_s23 = scalar_lea.hbm (!%p192_p9), %s3205_s5, %s2758_s7 }
  0x10   : > { %s218_s25 = scalar_lea.vmem (!%p192_p9), [#allocation2], %s3164_s16  ;;  %s2106_s30 = sshll.u32 (!%p192_p9), %s2102_s23, 4  ;;  %s2107_s30 = int_to_ptr.hbm [resolvable:$true] %s2106_s30 }
  0x11   : > { %s2104_s26 = sshll.u32 (!%p192_p9), %s218_s25, 4  ;;  %s2629_s6 = sshra.s32 (!%p192_p9), %s2107_s30, 4  ;;  %s2105_s26 = int_to_ptr.vmem [resolvable:$true] %s2104_s26  ;;  %s2630_s6 = int_to_ptr.hbm [resolvable:$true] %s2629_s6 }
  0x12   : > { %s2635_s11 = scalar_lea.hbm (!%p192_p9), %s3205_s5, 16  ;;  %p2636_p0 = scmp.lt.s32.totalorder (!%p192_p9), %s2630_s6, %s3205_s5 }
  0x13   : > { %v260_v0 = vld [vmem:[%s3204_s4] sm:$0xff]  ;;  %v2679_v1 = vmov 0   ;;  %s221_s8 = scalar_select %p220_p10, %s2758_s7, 15  ;;  %v261_v2 = vld [vmem:[%s3204_s4 + $0x8] sm:$0xff]  ;;  %v2217_v5 = vld [vmem:[%s3204_s4 + $0x30] sm:$0xff]  ;;  %vm281_vm0 = vcmask 1040384  }
  0x14   : > { %2356 = vset.pattern.permute.xlu0 %v2679_v1  ;;  %2357 = vset.pattern.permute.xlu1 %v2679_v1  ;;  %v2308_v18 = vld [vmem:[%s3201_s1] sm:$0xff]  ;;  %vm277_vm1 = vcmask 15360   ;;  %v2234_v31 = vld [vmem:[%s3204_s4 + $0x48] sm:$0xff]  ;;  %v2282_v33 = vld [vmem:[%s3204_s4 + $0x78] sm:$0xff]  ;;  %vm510_vm2 = vcmask 130048   ;;  %vm2077_vm3 = vcmask 1042434  }
  0x15   : > { %264 = vperm.xlu0 %2356, %v260_v0   ;;  %2358 = vset.pattern.permute.xlu2 %v2679_v1  ;;  %s2172_s9 = sshll.u32 %s221_s8, 1  ;;  %v2265_v32 = vld [vmem:[%s3204_s4 + $0x60] sm:$0xff]  ;;  %v2185_v34 = vld [vmem:[%s3204_s4 + $0x10] sm:$0xff]  ;;  %v2186_v35 = vld [vmem:[%s3204_s4 + $0x18] sm:$0xff]  ;;  %vm2081_vm4 = vcmask 1044484   ;;  %vm2083_vm5 = vcmask 1046534  }
  0x16   : > { %s223_s12 = scalar_lea.vmem %s3200_s0, %s2172_s9  ;;  %497 = vperm.xlu1 %2357, %v2185_v34   ;;  %v2218_v37 = vld [vmem:[%s3204_s4 + $0x38] sm:$0xff]  ;;  %v2249_v42 = vld [vmem:[%s3204_s4 + $0x50] sm:$0xff]  ;;  %v2266_v58 = vld [vmem:[%s3204_s4 + $0x68] sm:$0xff]  ;;  %vm2079_vm6 = vcmask 1041408   ;;  %vm2085_vm7 = vcmask 1045508   ;;  %vm2087_vm8 = vcmask 1043456  }
  0x17   : > { %v229_v3 = vld [vmem:[%s223_s12] sm:$0xff]  ;;  %v230_v4 = vld [vmem:[%s223_s12 + $0x8] sm:$0xff]  ;;  %s2092_s7 = scalar_lea.sflag [#allocation3], %s216_s15  ;;  %s2631_s8 = scalar_lea.hbm %s2630_s6, 8 }
  0x18   : > { %233 = vst [vmem:[#allocation1] ss:$4 sm:$0xff] %v229_v3  ;;  %p2632_p11 = scmp.ne.s32.totalorder %s2630_s6, %s2631_s8  ;;  %p2637_p1 = scmp.lt.s32.totalorder %s2635_s11, %s2631_s8 }
  0x19   : > { %235 = vst [vmem:[#allocation1 + $0x20] ss:$4 sm:$0xff] %v230_v4 }
  0x1a   : > { %p2633_p12 = pnand %p2632_p11, %p2745_p5  ;;  %p2638_p2 = por %p2637_p1, %p2636_p0 }
  0x1c   : > { %p2634_p13 = pneg %p2633_p12 }
  0x1d   : > { %269 = vperm.xlu0 %2356, %v261_v2  }
  0x1e   : > { %502 = vperm.xlu1 %2357, %v2186_v35   ;;  %v2838_v35 = vld [vmem:[%s3202_s2] sm:$0xff]  ;;  %p2639_p3 = pnand %p2638_p2, %p2634_p13 }
  0x1f   : > { %v236_v6 = vld.sshfl [vmem:[#allocation1] sm:$0xff pattern:$0x73625140]  ;;  %v237_v7 = vld.sshfl [vmem:[#allocation1 + $0x8] sm:$0xff pattern:$0x73625140] }
  0x20   : > { %v252_v8 = vpack.c.bf16 %v236_v6, %v236_v6  ;;  %v253_v9 = vpack.c.bf16 %v237_v7, %v237_v7  ;;  %v238_v10 = vld.sshfl [vmem:[#allocation1 + $0x10] sm:$0xff pattern:$0x73625140]  ;;  %v239_v11 = vld.sshfl [vmem:[#allocation1 + $0x18] sm:$0xff pattern:$0x73625140] }
  0x21   : > { %v254_v12 = vpack.c.bf16 %v238_v10, %v238_v10  ;;  %v255_v13 = vpack.c.bf16 %v239_v11, %v239_v11  ;;  %v240_v14 = vld.sshfl [vmem:[#allocation1 + $0x20] sm:$0xff pattern:$0x73625140]  ;;  %v241_v15 = vld.sshfl [vmem:[#allocation1 + $0x28] sm:$0xff pattern:$0x73625140] }
  0x22   : > { %v283_v16 = vsel %vm281_vm0, %v252_v8, 0  ;;  %v286_v17 = vsel %vm281_vm0, %v253_v9, 0  ;;  %v256_v19 = vpack.c.bf16 %v240_v14, %v240_v14  ;;  %v257_v20 = vpack.c.bf16 %v241_v15, %v241_v15  ;;  %v242_v21 = vld.sshfl [vmem:[#allocation1 + $0x30] sm:$0xff pattern:$0x73625140] }
  0x23   : > { %313 = vmatpush.bf16.msra.mxu0 %v283_v16  ;;  %327 = vmatpush.bf16.msra.mxu1 %v286_v17  ;;  %v289_v22 = vsel %vm281_vm0, %v254_v12, 0  ;;  %v292_v23 = vsel %vm281_vm0, %v255_v13, 0  ;;  %v258_v24 = vpack.c.bf16 %v242_v21, %v242_v21  ;;  %v243_v25 = vld.sshfl [vmem:[#allocation1 + $0x38] sm:$0xff pattern:$0x73625140]  ;;  %v2295_v13 = vld [vmem:[%s3204_s4 + $0x80] sm:$0xff] }
  0x24   : > { %341 = vmatpush.bf16.msra.mxu2 %v289_v22  ;;  %355 = vmatpush.bf16.msra.mxu3 %v292_v23  ;;  %v295_v26 = vsel %vm281_vm0, %v256_v19, 0  ;;  %v298_v27 = vsel %vm281_vm0, %v257_v20, 0  ;;  %v259_v28 = vpack.c.bf16 %v243_v25, %v243_v25 }
  0x25   : > { %914 = vperm.xlu0 %2356, %v2217_v5   ;;  %v301_v29 = vsel %vm281_vm0, %v258_v24, 0 }
  0x26   : > { %2177 = vmatmul.msk.bf16.vlgmr.msra.gmra.mxu0 %vm277_vm1, %v2308_v18  ;;  %2178 = vmatmul.msk.bf16.vlgmr.msra.gmra.mxu1 %vm277_vm1, %v2308_v18  ;;  %v304_v30 = vsel %vm281_vm0, %v259_v28, 0 }
  0x27   : > { %369 = vmatpush.bf16.msrb.mxu0 %v295_v26  ;;  %383 = vmatpush.bf16.msrb.mxu1 %v298_v27 }
  0x28   : > { %2179 = vmatmul.msk.bf16.vlgmr.msra.gmra.mxu2 %vm277_vm1, %v2308_v18  ;;  %2180 = vmatmul.msk.bf16.vlgmr.msra.gmra.mxu3 %vm277_vm1, %v2308_v18 }
  0x29   : > { %397 = vmatpush.bf16.msrb.mxu2 %v301_v29  ;;  %411 = vmatpush.bf16.msrb.mxu3 %v304_v30 }
  0x2a   : > { %919 = vperm.xlu1 %2357, %v2218_v37  }
  0x2d   : > { %1127 = vperm.xlu0 %2356, %v2234_v31  }
  0x32   : > { %1330 = vperm.xlu1 %2357, %v2249_v42  }
  0x35   : > { %1538 = vperm.xlu0 %2356, %v2265_v32  }
  0x36   : > { %2181 = vmatmul.msk.bf16.vlgmr.msrb.gmra.mxu0 %vm277_vm1, %v2308_v18  ;;  %2182 = vmatmul.msk.bf16.vlgmr.msrb.gmra.mxu1 %vm277_vm1, %v2308_v18 }
  0x38   : > { %2183 = vmatmul.msk.bf16.vlgmr.msrb.gmra.mxu2 %vm277_vm1, %v2308_v18  ;;  %2184 = vmatmul.msk.bf16.vlgmr.msrb.gmra.mxu3 %vm277_vm1, %v2308_v18 }
  0x3a   : > { %1543 = vperm.xlu1 %2357, %v2266_v58  }
  0x3d   : > { %1751 = vperm.xlu0 %2356, %v2282_v33  }
  0x42   : > { %1951 = vperm.xlu1 %2357, %v2295_v13  }
  0x87   : > { %v2805_v36 = vpop.permute.xlu0 %264 }
  0x8f   : > { %v2815_v43 = vpop.permute.xlu0 %269 }
  0xa3   : > { %v315_v38 = vpop.f32.mrf.mxu0  ;;  %v329_v39 = vpop.f32.mrf.mxu1 }
  0xa4   : > { %v316_v40 = vadd.f32 %v315_v38, %v2805_v36  ;;  %v330_v41 = vadd.f32 %v329_v39, %v2805_v36 }
  0xa6   : > { %v418_v44 = vmul.f32 0.5, %v316_v40  ;;  %v419_v45 = vmul.f32 0.5, %v330_v41 }
  0xa8   : > { %2359 = vtanh.f32 %v418_v44 }
  0xa9   : > { %2361 = vtanh.f32 %v419_v45 }
  0xab   : > { %v343_v46 = vpop.f32.mrf.mxu2  ;;  %v357_v47 = vpop.f32.mrf.mxu3 }
  0xac   : > { %v344_v48 = vadd.f32 %v343_v46, %v2805_v36  ;;  %v317_v49 = vpop.f32.mrf.mxu0  ;;  %v331_v50 = vpop.f32.mrf.mxu1  ;;  %v358_v51 = vadd.f32 %v357_v47, %v2805_v36 }
  0xad   : > { %v318_v52 = vadd.f32 %v317_v49, %v2815_v43  ;;  %v332_v53 = vadd.f32 %v331_v50, %v2815_v43 }
  0xae   : > { %v420_v54 = vmul.f32 0.5, %v344_v48  ;;  %v421_v57 = vmul.f32 0.5, %v358_v51  ;;  %v2360_v61 = vpop.eup %2359 }
  0xaf   : > { %v426_v55 = vmul.f32 0.5, %v318_v52  ;;  %v427_v56 = vmul.f32 0.5, %v332_v53  ;;  %v2362_v2 = vpop.eup %2361  ;;  %v450_v7 = vmul.f32 0.5, %v2360_v61 }
  0xb0   : > { %2363 = vtanh.f32 %v420_v54  ;;  %v451_v10 = vmul.f32 0.5, %v2362_v2 }
  0xb1   : > { %2365 = vtanh.f32 %v426_v55  ;;  %v466_v17 = vadd.f32 0.5, %v450_v7 }
  0xb2   : > { %2367 = vtanh.f32 %v427_v56  ;;  %v467_v22 = vadd.f32 0.5, %v451_v10 }
  0xb3   : > { %v345_v59 = vpop.f32.mrf.mxu2  ;;  %v359_v60 = vpop.f32.mrf.mxu3  ;;  %2369 = vtanh.f32 %v421_v57 }
  0xb4   : > { %v346_v62 = vadd.f32 %v345_v59, %v2815_v43  ;;  %v360_v63 = vadd.f32 %v359_v60, %v2815_v43  ;;  %v371_v0 = vpop.f32.mrf.mxu0  ;;  %v385_v1 = vpop.f32.mrf.mxu1 }
  0xb5   : > { %v372_v5 = vadd.f32 %v371_v0, %v2805_v36  ;;  %v386_v8 = vadd.f32 %v385_v1, %v2805_v36 }
  0xb6   : > { %v428_v3 = vmul.f32 0.5, %v346_v62  ;;  %v429_v4 = vmul.f32 0.5, %v360_v63  ;;  %v2364_v6 = vpop.eup %2363 }
  0xb7   : > { %v2366_v9 = vpop.eup %2365  ;;  %v422_v15 = vmul.f32 0.5, %v372_v5  ;;  %v423_v19 = vmul.f32 0.5, %v386_v8  ;;  %v452_v23 = vmul.f32 0.5, %v2364_v6 }
  0xb8   : > { %2371 = vtanh.f32 %v428_v3  ;;  %v2368_v11 = vpop.eup %2367  ;;  %v458_v12 = vmul.f32 0.5, %v2366_v9 }
  0xb9   : > { %2373 = vtanh.f32 %v429_v4  ;;  %v459_v14 = vmul.f32 0.5, %v2368_v11  ;;  %v2370_v16 = vpop.eup %2369  ;;  %v468_v42 = vadd.f32 0.5, %v452_v23 }
  0xba   : > { %v474_v18 = vadd.f32 0.5, %v458_v12  ;;  %v453_v33 = vmul.f32 0.5, %v2370_v16  ;;  %2375 = vtanh.f32 %v422_v15 }
  0xbb   : > { %v399_v20 = vpop.f32.mrf.mxu2  ;;  %v413_v21 = vpop.f32.mrf.mxu3  ;;  %v475_v24 = vadd.f32 0.5, %v459_v14  ;;  %2377 = vtanh.f32 %v423_v19 }
  0xbc   : > { %v400_v25 = vadd.f32 %v399_v20, %v2805_v36  ;;  %v373_v26 = vpop.f32.mrf.mxu0  ;;  %v387_v27 = vpop.f32.mrf.mxu1  ;;  %v484_v28 = vpack.c.bf16 %v474_v18, %v466_v17  ;;  %v414_v29 = vadd.f32 %v413_v21, %v2805_v36  ;;  %v469_v46 = vadd.f32 0.5, %v453_v33 }
  0xbd   : > { %v374_v30 = vadd.f32 %v373_v26, %v2815_v43  ;;  %v388_v31 = vadd.f32 %v387_v27, %v2815_v43  ;;  %v485_v34 = vpack.c.bf16 %v475_v24, %v467_v22  ;;  %v2858_v19 = vpop.permute.xlu1 %497 }
  0xbe   : > { %v2372_v32 = vpop.eup %2371  ;;  %521 = vmatpush.bf16.msra.mxu0 %v484_v28  ;;  %v424_v41 = vmul.f32 0.5, %v400_v25  ;;  %v425_v45 = vmul.f32 0.5, %v414_v29 }
  0xbf   : > { %v2374_v37 = vpop.eup %2373  ;;  %v460_v38 = vmul.f32 0.5, %v2372_v32  ;;  %v430_v39 = vmul.f32 0.5, %v374_v30  ;;  %v431_v40 = vmul.f32 0.5, %v388_v31  ;;  %535 = vmatpush.bf16.msra.mxu1 %v485_v34 }
  0xc0   : > { %v461_v36 = vmul.f32 0.5, %v2374_v37  ;;  %v2376_v51 = vpop.eup %2375 }
  0xc1   : > { %v476_v44 = vadd.f32 0.5, %v460_v38  ;;  %2379 = vtanh.f32 %v430_v39  ;;  %2191 = vmatmul.msk.bf16.vlgmr.msra.gmra.mxu0 %vm510_vm2, %v2838_v35  ;;  %v2378_v55 = vpop.eup %2377  ;;  %v454_v58 = vmul.f32 0.5, %v2376_v51 }
  0xc2   : > { %v477_v47 = vadd.f32 0.5, %v461_v36  ;;  %2381 = vtanh.f32 %v431_v40  ;;  %2192 = vmatmul.msk.bf16.vlgmr.msra.gmra.mxu1 %vm510_vm2, %v2838_v35  ;;  %v455_v60 = vmul.f32 0.5, %v2378_v55 }
  0xc3   : > { %v486_v48 = vpack.c.bf16 %v476_v44, %v468_v42  ;;  %v401_v49 = vpop.f32.mrf.mxu2  ;;  %v415_v50 = vpop.f32.mrf.mxu3  ;;  %2383 = vtanh.f32 %v424_v41  ;;  %v470_v1 = vadd.f32 0.5, %v454_v58 }
  0xc4   : > { %v487_v52 = vpack.c.bf16 %v477_v47, %v469_v46  ;;  %v402_v53 = vadd.f32 %v401_v49, %v2815_v43  ;;  %v416_v54 = vadd.f32 %v415_v50, %v2815_v43  ;;  %2385 = vtanh.f32 %v425_v45 }
  0xc5   : > { %549 = vmatpush.bf16.msra.mxu2 %v486_v48  ;;  %v471_v3 = vadd.f32 0.5, %v455_v60  ;;  %v2862_v26 = vpop.permute.xlu1 %502  ;;  %v2201_v48 = vld [vmem:[%s3204_s4 + $0x20] sm:$0xff] }
  0xc6   : > { %v432_v56 = vmul.f32 0.5, %v402_v53  ;;  %v433_v57 = vmul.f32 0.5, %v416_v54  ;;  %563 = vmatpush.bf16.msra.mxu3 %v487_v52  ;;  %706 = vperm.xlu2 %2358, %v2201_v48  }
  0xc7   : > { %v2380_v59 = vpop.eup %2379 }
  0xc8   : > { %2387 = vtanh.f32 %v432_v56  ;;  %2193 = vmatmul.msk.bf16.vlgmr.msra.gmra.mxu2 %vm510_vm2, %v2838_v35  ;;  %v2382_v61 = vpop.eup %2381  ;;  %v462_v62 = vmul.f32 0.5, %v2380_v59 }
  0xc9   : > { %2389 = vtanh.f32 %v433_v57  ;;  %2194 = vmatmul.msk.bf16.vlgmr.msra.gmra.mxu3 %vm510_vm2, %v2838_v35  ;;  %v2384_v43 = vpop.eup %2383  ;;  %v463_v63 = vmul.f32 0.5, %v2382_v61 }
  0xca   : > { %v2386_v0 = vpop.eup %2385  ;;  %v478_v2 = vadd.f32 0.5, %v462_v62  ;;  %v456_v5 = vmul.f32 0.5, %v2384_v43 }
  0xcb   : > { %v479_v4 = vadd.f32 0.5, %v463_v63  ;;  %v457_v8 = vmul.f32 0.5, %v2386_v0 }
  0xcc   : > { %v488_v6 = vpack.c.bf16 %v478_v2, %v470_v1  ;;  %v472_v13 = vadd.f32 0.5, %v456_v5  ;;  %v2879_v5 = vld [vmem:[%s3202_s2 + $0x8] sm:$0xff] }
  0xcd   : > { %v489_v9 = vpack.c.bf16 %v479_v4, %v471_v3  ;;  %v473_v15 = vadd.f32 0.5, %v457_v8 }
  0xce   : > { %v2388_v7 = vpop.eup %2387  ;;  %577 = vmatpush.bf16.msrb.mxu0 %v488_v6 }
  0xcf   : > { %v2390_v10 = vpop.eup %2389  ;;  %v464_v11 = vmul.f32 0.5, %v2388_v7  ;;  %591 = vmatpush.bf16.msrb.mxu1 %v489_v9  ;;  %v2202_v7 = vld [vmem:[%s3204_s4 + $0x28] sm:$0xff] }
  0xd0   : > { %v465_v12 = vmul.f32 0.5, %v2390_v10  ;;  %711 = vperm.xlu2 %2358, %v2202_v7  }
  0xd1   : > { %v480_v14 = vadd.f32 0.5, %v464_v11  ;;  %2195 = vmatmul.msk.bf16.vlgmr.msrb.gmra.mxu0 %vm510_vm2, %v2838_v35 }
  0xd2   : > { %v481_v16 = vadd.f32 0.5, %v465_v12  ;;  %2196 = vmatmul.msk.bf16.vlgmr.msrb.gmra.mxu1 %vm510_vm2, %v2838_v35 }
  0xd3   : > { %v490_v17 = vpack.c.bf16 %v480_v14, %v472_v13 }
  0xd4   : > { %v491_v18 = vpack.c.bf16 %v481_v16, %v473_v15 }
  0xd5   : > { %605 = vmatpush.bf16.msrb.mxu2 %v490_v17 }
  0xd6   : > { %619 = vmatpush.bf16.msrb.mxu3 %v491_v18 }
  0xd8   : > { %2197 = vmatmul.msk.bf16.vlgmr.msrb.gmra.mxu2 %vm510_vm2, %v2838_v35 }
  0xd9   : > { %2198 = vmatmul.msk.bf16.vlgmr.msrb.gmra.mxu3 %vm510_vm2, %v2838_v35 }
 0x13e   : > { %v523_v20 = vpop.f32.mrf.mxu0 }
 0x13f   : > { %v524_v21 = vadd.f32 %v523_v20, %v2858_v19  ;;  %v537_v22 = vpop.f32.mrf.mxu1 }
 0x140   : > { %v538_v23 = vadd.f32 %v537_v22, %v2858_v19 }
 0x141   : > { %v626_v24 = vmul.f32 0.5, %v524_v21 }
 0x142   : > { %v627_v25 = vmul.f32 0.5, %v538_v23 }
 0x143   : > { %2391 = vtanh.f32 %v626_v24  ;;  %v2233_v24 = vld [vmem:[%s3204_s4 + $0x40] sm:$0xff] }
 0x144   : > { %2393 = vtanh.f32 %v627_v25  ;;  %1122 = vperm.xlu2 %2358, %v2233_v24  }
 0x146   : > { %v525_v27 = vpop.f32.mrf.mxu0 }
 0x147   : > { %v526_v28 = vadd.f32 %v525_v27, %v2862_v26  ;;  %v539_v29 = vpop.f32.mrf.mxu1 }
 0x148   : > { %v540_v30 = vadd.f32 %v539_v29, %v2862_v26 }
 0x149   : > { %v634_v31 = vmul.f32 0.5, %v526_v28  ;;  %v2392_v34 = vpop.eup %2391 }
 0x14a   : > { %v635_v32 = vmul.f32 0.5, %v540_v30  ;;  %v2394_v38 = vpop.eup %2393  ;;  %v658_v40 = vmul.f32 0.5, %v2392_v34 }
 0x14b   : > { %v551_v33 = vpop.f32.mrf.mxu2  ;;  %2395 = vtanh.f32 %v634_v31  ;;  %v659_v41 = vmul.f32 0.5, %v2394_v38 }
 0x14c   : > { %v552_v35 = vadd.f32 %v551_v33, %v2858_v19  ;;  %v565_v37 = vpop.f32.mrf.mxu3  ;;  %2397 = vtanh.f32 %v635_v32  ;;  %v674_v52 = vadd.f32 0.5, %v658_v40 }
 0x14d   : > { %v566_v39 = vadd.f32 %v565_v37, %v2858_v19  ;;  %v675_v56 = vadd.f32 0.5, %v659_v41 }
 0x14e   : > { %v579_v36 = vpop.f32.mrf.mxu0  ;;  %v628_v42 = vmul.f32 0.5, %v552_v35 }
 0x14f   : > { %v580_v44 = vadd.f32 %v579_v36, %v2858_v19  ;;  %v593_v45 = vpop.f32.mrf.mxu1  ;;  %v629_v46 = vmul.f32 0.5, %v566_v39 }
 0x150   : > { %v594_v47 = vadd.f32 %v593_v45, %v2858_v19  ;;  %2399 = vtanh.f32 %v628_v42 }
 0x151   : > { %v2396_v49 = vpop.eup %2395  ;;  %v630_v50 = vmul.f32 0.5, %v580_v44  ;;  %2401 = vtanh.f32 %v629_v46 }
 0x152   : > { %v2398_v51 = vpop.eup %2397  ;;  %v666_v53 = vmul.f32 0.5, %v2396_v49  ;;  %v631_v54 = vmul.f32 0.5, %v594_v47 }
 0x153   : > { %v553_v55 = vpop.f32.mrf.mxu2  ;;  %v667_v57 = vmul.f32 0.5, %v2398_v51  ;;  %2403 = vtanh.f32 %v630_v50 }
 0x154   : > { %v554_v58 = vadd.f32 %v553_v55, %v2862_v26  ;;  %v567_v59 = vpop.f32.mrf.mxu3  ;;  %v682_v60 = vadd.f32 0.5, %v666_v53  ;;  %2405 = vtanh.f32 %v631_v54 }
 0x155   : > { %v568_v61 = vadd.f32 %v567_v59, %v2862_v26  ;;  %v683_v62 = vadd.f32 0.5, %v667_v57 }
 0x156   : > { %v636_v43 = vmul.f32 0.5, %v554_v58  ;;  %v693_v63 = vpack.c.bf16 %v682_v60, %v674_v52  ;;  %v581_v1 = vpop.f32.mrf.mxu0  ;;  %v2400_v8 = vpop.eup %2399  ;;  %v2250_v52 = vld [vmem:[%s3204_s4 + $0x58] sm:$0xff]  ;;  %v2281_v60 = vld [vmem:[%s3204_s4 + $0x70] sm:$0xff] }
 0x157   : > { %v637_v0 = vmul.f32 0.5, %v568_v61  ;;  %v694_v2 = vpack.c.bf16 %v683_v62, %v675_v56  ;;  %v582_v3 = vadd.f32 %v581_v1, %v2862_v26  ;;  %v595_v4 = vpop.f32.mrf.mxu1  ;;  %v2402_v10 = vpop.eup %2401  ;;  %v660_v17 = vmul.f32 0.5, %v2400_v8  ;;  %1335 = vperm.xlu2 %2358, %v2250_v52  }
 0x158   : > { %2407 = vtanh.f32 %v636_v43  ;;  %v596_v6 = vadd.f32 %v595_v4, %v2862_v26  ;;  %729 = vmatpush.bf16.msra.mxu0 %v693_v63  ;;  %v661_v21 = vmul.f32 0.5, %v2402_v10 }
 0x159   : > { %2409 = vtanh.f32 %v637_v0  ;;  %v638_v9 = vmul.f32 0.5, %v582_v3  ;;  %743 = vmatpush.bf16.msra.mxu1 %v694_v2  ;;  %v2404_v13 = vpop.eup %2403  ;;  %v676_v28 = vadd.f32 0.5, %v660_v17  ;;  %v2914_v3 = vpop.permute.xlu2 %706 }
 0x15a   : > { %v639_v11 = vmul.f32 0.5, %v596_v6  ;;  %v2406_v16 = vpop.eup %2405  ;;  %v662_v29 = vmul.f32 0.5, %v2404_v13  ;;  %v677_v33 = vadd.f32 0.5, %v661_v21 }
 0x15b   : > { %v607_v12 = vpop.f32.mrf.mxu2  ;;  %2411 = vtanh.f32 %v638_v9  ;;  %2207 = vmatmul.msk.bf16.vlgmr.msra.gmra.mxu0 %vm510_vm2, %v2879_v5 }
 0x15c   : > { %v608_v14 = vadd.f32 %v607_v12, %v2858_v19  ;;  %v621_v15 = vpop.f32.mrf.mxu3  ;;  %2413 = vtanh.f32 %v639_v11  ;;  %2208 = vmatmul.msk.bf16.vlgmr.msra.gmra.mxu1 %vm510_vm2, %v2879_v5  ;;  %v678_v44 = vadd.f32 0.5, %v662_v29 }
 0x15d   : > { %v622_v18 = vadd.f32 %v621_v15, %v2858_v19  ;;  %v663_v19 = vmul.f32 0.5, %v2406_v16 }
 0x15e   : > { %v2408_v20 = vpop.eup %2407  ;;  %v632_v27 = vmul.f32 0.5, %v608_v14 }
 0x15f   : > { %v2410_v22 = vpop.eup %2409  ;;  %v668_v23 = vmul.f32 0.5, %v2408_v20  ;;  %v633_v31 = vmul.f32 0.5, %v622_v18  ;;  %v679_v47 = vadd.f32 0.5, %v663_v19  ;;  %1746 = vperm.xlu2 %2358, %v2281_v60  }
 0x160   : > { %v669_v25 = vmul.f32 0.5, %v2410_v22  ;;  %2415 = vtanh.f32 %v632_v27 }
 0x161   : > { %v684_v30 = vadd.f32 0.5, %v668_v23  ;;  %v2412_v32 = vpop.eup %2411  ;;  %2417 = vtanh.f32 %v633_v31  ;;  %v2918_v11 = vpop.permute.xlu2 %711 }
 0x162   : > { %v685_v34 = vadd.f32 0.5, %v669_v25  ;;  %v2414_v35 = vpop.eup %2413  ;;  %v670_v38 = vmul.f32 0.5, %v2412_v32 }
 0x163   : > { %v695_v37 = vpack.c.bf16 %v684_v30, %v676_v28  ;;  %v609_v39 = vpop.f32.mrf.mxu2  ;;  %v671_v36 = vmul.f32 0.5, %v2414_v35 }
 0x164   : > { %v696_v40 = vpack.c.bf16 %v685_v34, %v677_v33  ;;  %v610_v41 = vadd.f32 %v609_v39, %v2862_v26  ;;  %v623_v42 = vpop.f32.mrf.mxu3  ;;  %v686_v45 = vadd.f32 0.5, %v670_v38 }
 0x165   : > { %v624_v46 = vadd.f32 %v623_v42, %v2862_v26  ;;  %757 = vmatpush.bf16.msra.mxu2 %v695_v37  ;;  %v687_v48 = vadd.f32 0.5, %v671_v36 }
 0x166   : > { %v640_v49 = vmul.f32 0.5, %v610_v41  ;;  %771 = vmatpush.bf16.msra.mxu3 %v696_v40  ;;  %v697_v50 = vpack.c.bf16 %v686_v45, %v678_v44  ;;  %v2416_v26 = vpop.eup %2415 }
 0x167   : > { %v641_v51 = vmul.f32 0.5, %v624_v46  ;;  %v698_v53 = vpack.c.bf16 %v687_v48, %v679_v47  ;;  %v2418_v54 = vpop.eup %2417  ;;  %v664_v55 = vmul.f32 0.5, %v2416_v26  ;;  %v2930_v48 = vld [vmem:[%s3202_s2 + $0x10] sm:$0xff] }
 0x168   : > { %2419 = vtanh.f32 %v640_v49  ;;  %2209 = vmatmul.msk.bf16.vlgmr.msra.gmra.mxu2 %vm510_vm2, %v2879_v5  ;;  %785 = vmatpush.bf16.msrb.mxu0 %v697_v50  ;;  %v665_v57 = vmul.f32 0.5, %v2418_v54 }
 0x169   : > { %2421 = vtanh.f32 %v641_v51  ;;  %2210 = vmatmul.msk.bf16.vlgmr.msra.gmra.mxu3 %vm510_vm2, %v2879_v5  ;;  %799 = vmatpush.bf16.msrb.mxu1 %v698_v53  ;;  %v680_v62 = vadd.f32 0.5, %v664_v55 }
 0x16a   : > { %v681_v63 = vadd.f32 0.5, %v665_v57 }
 0x16b   : > { %2211 = vmatmul.msk.bf16.vlgmr.msrb.gmra.mxu0 %vm510_vm2, %v2879_v5 }
 0x16c   : > { %2212 = vmatmul.msk.bf16.vlgmr.msrb.gmra.mxu1 %vm510_vm2, %v2879_v5 }
 0x16e   : > { %v2420_v56 = vpop.eup %2419 }
 0x16f   : > { %v2422_v58 = vpop.eup %2421  ;;  %v672_v59 = vmul.f32 0.5, %v2420_v56 }
 0x170   : > { %v673_v61 = vmul.f32 0.5, %v2422_v58 }
 0x171   : > { %v688_v43 = vadd.f32 0.5, %v672_v59 }
 0x172   : > { %v689_v0 = vadd.f32 0.5, %v673_v61 }
 0x173   : > { %v699_v1 = vpack.c.bf16 %v688_v43, %v680_v62 }
 0x174   : > { %v700_v2 = vpack.c.bf16 %v689_v0, %v681_v63 }
 0x175   : > { %813 = vmatpush.bf16.msrb.mxu2 %v699_v1 }
 0x176   : > { %827 = vmatpush.bf16.msrb.mxu3 %v700_v2 }
 0x178   : > { %2213 = vmatmul.msk.bf16.vlgmr.msrb.gmra.mxu2 %vm510_vm2, %v2879_v5 }
 0x179   : > { %2214 = vmatmul.msk.bf16.vlgmr.msrb.gmra.mxu3 %vm510_vm2, %v2879_v5 }
 0x1d8   : > { %v731_v4 = vpop.f32.mrf.mxu0 }
 0x1d9   : > { %v732_v6 = vadd.f32 %v731_v4, %v2914_v3  ;;  %v745_v7 = vpop.f32.mrf.mxu1 }
 0x1da   : > { %v746_v8 = vadd.f32 %v745_v7, %v2914_v3 }
 0x1db   : > { %v834_v9 = vmul.f32 0.5, %v732_v6 }
 0x1dc   : > { %v835_v10 = vmul.f32 0.5, %v746_v8 }
 0x1dd   : > { %2423 = vtanh.f32 %v834_v9 }
 0x1de   : > { %2425 = vtanh.f32 %v835_v10 }
 0x1e0   : > { %v733_v12 = vpop.f32.mrf.mxu0 }
 0x1e1   : > { %v734_v13 = vadd.f32 %v733_v12, %v2918_v11  ;;  %v747_v14 = vpop.f32.mrf.mxu1 }
 0x1e2   : > { %v748_v5 = vadd.f32 %v747_v14, %v2918_v11 }
 0x1e3   : > { %v842_v15 = vmul.f32 0.5, %v734_v13  ;;  %v2424_v17 = vpop.eup %2423 }
 0x1e4   : > { %v843_v16 = vmul.f32 0.5, %v748_v5  ;;  %v2426_v18 = vpop.eup %2425  ;;  %v866_v20 = vmul.f32 0.5, %v2424_v17 }
 0x1e5   : > { %2427 = vtanh.f32 %v842_v15  ;;  %v867_v22 = vmul.f32 0.5, %v2426_v18 }
 0x1e6   : > { %2429 = vtanh.f32 %v843_v16  ;;  %v882_v32 = vadd.f32 0.5, %v866_v20 }
 0x1e7   : > { %v883_v34 = vadd.f32 0.5, %v867_v22 }
 0x1e8   : > { %v787_v21 = vpop.f32.mrf.mxu0 }
 0x1e9   : > { %v788_v23 = vadd.f32 %v787_v21, %v2914_v3  ;;  %v801_v24 = vpop.f32.mrf.mxu1 }
 0x1ea   : > { %v802_v25 = vadd.f32 %v801_v24, %v2914_v3 }
 0x1eb   : > { %v759_v27 = vpop.f32.mrf.mxu2  ;;  %v2428_v28 = vpop.eup %2427  ;;  %v838_v37 = vmul.f32 0.5, %v788_v23 }
 0x1ec   : > { %v760_v29 = vadd.f32 %v759_v27, %v2914_v3  ;;  %v773_v30 = vpop.f32.mrf.mxu3  ;;  %v2430_v31 = vpop.eup %2429  ;;  %v874_v33 = vmul.f32 0.5, %v2428_v28  ;;  %v839_v39 = vmul.f32 0.5, %v802_v25 }
 0x1ed   : > { %v774_v19 = vadd.f32 %v773_v30, %v2914_v3  ;;  %v875_v35 = vmul.f32 0.5, %v2430_v31  ;;  %2431 = vtanh.f32 %v838_v37 }
 0x1ee   : > { %v890_v38 = vadd.f32 0.5, %v874_v33  ;;  %v836_v36 = vmul.f32 0.5, %v760_v29  ;;  %2433 = vtanh.f32 %v839_v39 }
 0x1ef   : > { %v891_v40 = vadd.f32 0.5, %v875_v35  ;;  %v837_v42 = vmul.f32 0.5, %v774_v19 }
 0x1f0   : > { %v901_v41 = vpack.c.bf16 %v890_v38, %v882_v32  ;;  %v789_v44 = vpop.f32.mrf.mxu0  ;;  %2435 = vtanh.f32 %v836_v36 }
 0x1f1   : > { %v902_v45 = vpack.c.bf16 %v891_v40, %v883_v34  ;;  %v790_v46 = vadd.f32 %v789_v44, %v2918_v11  ;;  %v803_v47 = vpop.f32.mrf.mxu1  ;;  %2437 = vtanh.f32 %v837_v42 }
 0x1f2   : > { %v804_v49 = vadd.f32 %v803_v47, %v2918_v11  ;;  %937 = vmatpush.bf16.msra.mxu0 %v901_v41 }
 0x1f3   : > { %v761_v50 = vpop.f32.mrf.mxu2  ;;  %v846_v51 = vmul.f32 0.5, %v790_v46  ;;  %951 = vmatpush.bf16.msra.mxu1 %v902_v45  ;;  %v2432_v57 = vpop.eup %2431 }
 0x1f4   : > { %v762_v52 = vadd.f32 %v761_v50, %v2918_v11  ;;  %v775_v53 = vpop.f32.mrf.mxu3  ;;  %v847_v26 = vmul.f32 0.5, %v804_v49  ;;  %v2434_v58 = vpop.eup %2433  ;;  %v870_v61 = vmul.f32 0.5, %v2432_v57 }
 0x1f5   : > { %v776_v54 = vadd.f32 %v775_v53, %v2918_v11  ;;  %2439 = vtanh.f32 %v846_v51  ;;  %2223 = vmatmul.msk.bf16.vlgmr.msra.gmra.mxu0 %vm510_vm2, %v2930_v48  ;;  %v871_v63 = vmul.f32 0.5, %v2434_v58  ;;  %v2955_v49 = vpop.permute.xlu0 %914 }
 0x1f6   : > { %v844_v55 = vmul.f32 0.5, %v762_v52  ;;  %2441 = vtanh.f32 %v847_v26  ;;  %2224 = vmatmul.msk.bf16.vlgmr.msra.gmra.mxu1 %vm510_vm2, %v2930_v48  ;;  %v2436_v59 = vpop.eup %2435  ;;  %v886_v13 = vadd.f32 0.5, %v870_v61 }
 0x1f7   : > { %v845_v56 = vmul.f32 0.5, %v776_v54  ;;  %v2438_v60 = vpop.eup %2437  ;;  %v868_v4 = vmul.f32 0.5, %v2436_v59  ;;  %v887_v15 = vadd.f32 0.5, %v871_v63 }
 0x1f8   : > { %2443 = vtanh.f32 %v844_v55  ;;  %v869_v9 = vmul.f32 0.5, %v2438_v60  ;;  %v2959_v55 = vpop.permute.xlu1 %919 }
 0x1f9   : > { %2445 = vtanh.f32 %v845_v56  ;;  %v884_v20 = vadd.f32 0.5, %v868_v4 }
 0x1fa   : > { %v885_v24 = vadd.f32 0.5, %v869_v9 }
 0x1fb   : > { %v815_v62 = vpop.f32.mrf.mxu2  ;;  %v2440_v43 = vpop.eup %2439 }
 0x1fc   : > { %v816_v0 = vadd.f32 %v815_v62, %v2914_v3  ;;  %v829_v1 = vpop.f32.mrf.mxu3  ;;  %v2442_v2 = vpop.eup %2441  ;;  %v878_v6 = vmul.f32 0.5, %v2440_v43 }
 0x1fd   : > { %v830_v7 = vadd.f32 %v829_v1, %v2914_v3  ;;  %v879_v10 = vmul.f32 0.5, %v2442_v2 }
 0x1fe   : > { %v2444_v8 = vpop.eup %2443  ;;  %v894_v14 = vadd.f32 0.5, %v878_v6  ;;  %v840_v18 = vmul.f32 0.5, %v816_v0 }
 0x1ff   : > { %v2446_v12 = vpop.eup %2445  ;;  %v876_v5 = vmul.f32 0.5, %v2444_v8  ;;  %v895_v16 = vadd.f32 0.5, %v879_v10  ;;  %v841_v23 = vmul.f32 0.5, %v830_v7 }
 0x200   : > { %v877_v17 = vmul.f32 0.5, %v2446_v12  ;;  %v905_v21 = vpack.c.bf16 %v894_v14, %v886_v13  ;;  %2447 = vtanh.f32 %v840_v18 }
 0x201   : > { %v892_v22 = vadd.f32 0.5, %v876_v5  ;;  %v906_v25 = vpack.c.bf16 %v895_v16, %v887_v15  ;;  %2449 = vtanh.f32 %v841_v23 }
 0x202   : > { %v893_v27 = vadd.f32 0.5, %v877_v17  ;;  %993 = vmatpush.bf16.msrb.mxu0 %v905_v21 }
 0x203   : > { %v903_v28 = vpack.c.bf16 %v892_v22, %v884_v20  ;;  %v817_v3 = vpop.f32.mrf.mxu2  ;;  %1007 = vmatpush.bf16.msrb.mxu1 %v906_v25  ;;  %v2970_v25 = vld [vmem:[%s3202_s2 + $0x18] sm:$0xff] }
 0x204   : > { %v904_v29 = vpack.c.bf16 %v893_v27, %v885_v24  ;;  %v818_v30 = vadd.f32 %v817_v3, %v2918_v11  ;;  %v831_v31 = vpop.f32.mrf.mxu3 }
 0x205   : > { %v832_v32 = vadd.f32 %v831_v31, %v2918_v11  ;;  %965 = vmatpush.bf16.msra.mxu2 %v903_v28  ;;  %2227 = vmatmul.msk.bf16.vlgmr.msrb.gmra.mxu0 %vm510_vm2, %v2930_v48 }
 0x206   : > { %v848_v33 = vmul.f32 0.5, %v818_v30  ;;  %979 = vmatpush.bf16.msra.mxu3 %v904_v29  ;;  %2228 = vmatmul.msk.bf16.vlgmr.msrb.gmra.mxu1 %vm510_vm2, %v2930_v48  ;;  %v2448_v34 = vpop.eup %2447 }
 0x207   : > { %v849_v19 = vmul.f32 0.5, %v832_v32  ;;  %v2450_v11 = vpop.eup %2449  ;;  %v872_v35 = vmul.f32 0.5, %v2448_v34 }
 0x208   : > { %2451 = vtanh.f32 %v848_v33  ;;  %2225 = vmatmul.msk.bf16.vlgmr.msra.gmra.mxu2 %vm510_vm2, %v2930_v48  ;;  %v873_v38 = vmul.f32 0.5, %v2450_v11 }
 0x209   : > { %2453 = vtanh.f32 %v849_v19  ;;  %2226 = vmatmul.msk.bf16.vlgmr.msra.gmra.mxu3 %vm510_vm2, %v2930_v48  ;;  %v888_v41 = vadd.f32 0.5, %v872_v35 }
 0x20a   : > { %v889_v44 = vadd.f32 0.5, %v873_v38 }
 0x20e   : > { %v2452_v37 = vpop.eup %2451 }
 0x20f   : > { %v2454_v39 = vpop.eup %2453  ;;  %v880_v40 = vmul.f32 0.5, %v2452_v37 }
 0x210   : > { %v881_v36 = vmul.f32 0.5, %v2454_v39 }
 0x211   : > { %v896_v42 = vadd.f32 0.5, %v880_v40 }
 0x212   : > { %v897_v45 = vadd.f32 0.5, %v881_v36 }
 0x213   : > { %v907_v46 = vpack.c.bf16 %v896_v42, %v888_v41 }
 0x214   : > { %v908_v47 = vpack.c.bf16 %v897_v45, %v889_v44 }
 0x215   : > { %1021 = vmatpush.bf16.msrb.mxu2 %v907_v46 }
 0x216   : > { %1035 = vmatpush.bf16.msrb.mxu3 %v908_v47 }
 0x218   : > { %2229 = vmatmul.msk.bf16.vlgmr.msrb.gmra.mxu2 %vm510_vm2, %v2930_v48 }
 0x219   : > { %2230 = vmatmul.msk.bf16.vlgmr.msrb.gmra.mxu3 %vm510_vm2, %v2930_v48 }
 0x272   : > { %v939_v50 = vpop.f32.mrf.mxu0 }
 0x273   : > { %v940_v51 = vadd.f32 %v939_v50, %v2955_v49  ;;  %v953_v52 = vpop.f32.mrf.mxu1 }
 0x274   : > { %v954_v53 = vadd.f32 %v953_v52, %v2955_v49 }
 0x275   : > { %v1042_v26 = vmul.f32 0.5, %v940_v51 }
 0x276   : > { %v1043_v54 = vmul.f32 0.5, %v954_v53 }
 0x277   : > { %2455 = vtanh.f32 %v1042_v26 }
 0x278   : > { %2457 = vtanh.f32 %v1043_v54 }
 0x27a   : > { %v941_v56 = vpop.f32.mrf.mxu0 }
 0x27b   : > { %v942_v57 = vadd.f32 %v941_v56, %v2959_v55  ;;  %v955_v58 = vpop.f32.mrf.mxu1 }
 0x27c   : > { %v956_v48 = vadd.f32 %v955_v58, %v2959_v55 }
 0x27d   : > { %v1050_v59 = vmul.f32 0.5, %v942_v57  ;;  %v2456_v61 = vpop.eup %2455 }
 0x27e   : > { %v1051_v60 = vmul.f32 0.5, %v956_v48  ;;  %v2458_v62 = vpop.eup %2457  ;;  %v1074_v0 = vmul.f32 0.5, %v2456_v61 }
 0x27f   : > { %2459 = vtanh.f32 %v1050_v59  ;;  %v1075_v2 = vmul.f32 0.5, %v2458_v62 }
 0x280   : > { %2461 = vtanh.f32 %v1051_v60  ;;  %v1090_v10 = vadd.f32 0.5, %v1074_v0 }
 0x281   : > { %v1091_v13 = vadd.f32 0.5, %v1075_v2 }
 0x282   : > { %v995_v43 = vpop.f32.mrf.mxu0 }
 0x283   : > { %v1009_v63 = vpop.f32.mrf.mxu1  ;;  %v996_v4 = vadd.f32 %v995_v43, %v2955_v49 }
 0x284   : > { %v1010_v8 = vadd.f32 %v1009_v63, %v2955_v49 }
 0x285   : > { %v2460_v1 = vpop.eup %2459  ;;  %v1046_v5 = vmul.f32 0.5, %v996_v4 }
 0x286   : > { %v2462_v6 = vpop.eup %2461  ;;  %v1082_v7 = vmul.f32 0.5, %v2460_v1  ;;  %v1047_v16 = vmul.f32 0.5, %v1010_v8 }
 0x287   : > { %v1083_v9 = vmul.f32 0.5, %v2462_v6  ;;  %2463 = vtanh.f32 %v1046_v5 }
 0x288   : > { %v1098_v12 = vadd.f32 0.5, %v1082_v7  ;;  %2465 = vtanh.f32 %v1047_v16 }
 0x289   : > { %v1099_v14 = vadd.f32 0.5, %v1083_v9 }
 0x28a   : > { %v1109_v15 = vpack.c.bf16 %v1098_v12, %v1090_v10  ;;  %v997_v18 = vpop.f32.mrf.mxu0 }
 0x28b   : > { %v967_v17 = vpop.f32.mrf.mxu2  ;;  %v1110_v20 = vpack.c.bf16 %v1099_v14, %v1091_v13  ;;  %v998_v23 = vadd.f32 %v997_v18, %v2959_v55  ;;  %v1011_v24 = vpop.f32.mrf.mxu1 }
 0x28c   : > { %v968_v21 = vadd.f32 %v967_v17, %v2955_v49  ;;  %v981_v22 = vpop.f32.mrf.mxu3  ;;  %v1012_v28 = vadd.f32 %v1011_v24, %v2959_v55  ;;  %1145 = vmatpush.bf16.msra.mxu0 %v1109_v15 }
 0x28d   : > { %v982_v27 = vadd.f32 %v981_v22, %v2955_v49  ;;  %v1054_v3 = vmul.f32 0.5, %v998_v23  ;;  %1159 = vmatpush.bf16.msra.mxu1 %v1110_v20  ;;  %v2464_v33 = vpop.eup %2463 }
 0x28e   : > { %v1055_v29 = vmul.f32 0.5, %v1012_v28  ;;  %v1044_v30 = vmul.f32 0.5, %v968_v21  ;;  %v2466_v11 = vpop.eup %2465  ;;  %v1078_v38 = vmul.f32 0.5, %v2464_v33 }
 0x28f   : > { %2239 = vmatmul.msk.bf16.vlgmr.msra.gmra.mxu0 %vm510_vm2, %v2970_v25  ;;  %v1045_v31 = vmul.f32 0.5, %v982_v27  ;;  %2467 = vtanh.f32 %v1054_v3  ;;  %v1079_v36 = vmul.f32 0.5, %v2466_v11  ;;  %v3000_v11 = vpop.permute.xlu0 %1127 }
 0x290   : > { %2240 = vmatmul.msk.bf16.vlgmr.msra.gmra.mxu1 %vm510_vm2, %v2970_v25  ;;  %2469 = vtanh.f32 %v1055_v29  ;;  %v1094_v47 = vadd.f32 0.5, %v1078_v38  ;;  %v2996_v29 = vpop.permute.xlu2 %1122 }
 0x291   : > { %2471 = vtanh.f32 %v1044_v30  ;;  %v1095_v52 = vadd.f32 0.5, %v1079_v36 }
 0x292   : > { %2473 = vtanh.f32 %v1045_v31 }
 0x293   : > { %v969_v32 = vpop.f32.mrf.mxu2 }
 0x294   : > { %v970_v19 = vadd.f32 %v969_v32, %v2959_v55  ;;  %v983_v34 = vpop.f32.mrf.mxu3 }
 0x295   : > { %v984_v35 = vadd.f32 %v983_v34, %v2959_v55  ;;  %v2468_v40 = vpop.eup %2467 }
 0x296   : > { %v1052_v37 = vmul.f32 0.5, %v970_v19  ;;  %v2470_v41 = vpop.eup %2469  ;;  %v1086_v42 = vmul.f32 0.5, %v2468_v40 }
 0x297   : > { %v1053_v39 = vmul.f32 0.5, %v984_v35  ;;  %v2472_v44 = vpop.eup %2471  ;;  %v1087_v45 = vmul.f32 0.5, %v2470_v41 }
 0x298   : > { %2475 = vtanh.f32 %v1052_v37  ;;  %v2474_v46 = vpop.eup %2473  ;;  %v1102_v50 = vadd.f32 0.5, %v1086_v42  ;;  %v1076_v56 = vmul.f32 0.5, %v2472_v44 }
 0x299   : > { %2477 = vtanh.f32 %v1053_v39  ;;  %v1103_v53 = vadd.f32 0.5, %v1087_v45  ;;  %v1077_v59 = vmul.f32 0.5, %v2474_v46 }
 0x29a   : > { %v1113_v57 = vpack.c.bf16 %v1102_v50, %v1094_v47  ;;  %v1092_v0 = vadd.f32 0.5, %v1076_v56 }
 0x29b   : > { %v1023_v51 = vpop.f32.mrf.mxu2  ;;  %v1114_v60 = vpack.c.bf16 %v1103_v53, %v1095_v52  ;;  %v1093_v4 = vadd.f32 0.5, %v1077_v59 }
 0x29c   : > { %v1024_v26 = vadd.f32 %v1023_v51, %v2955_v49  ;;  %v1037_v54 = vpop.f32.mrf.mxu3  ;;  %1201 = vmatpush.bf16.msrb.mxu0 %v1113_v57 }
 0x29d   : > { %v1038_v58 = vadd.f32 %v1037_v54, %v2955_v49  ;;  %1215 = vmatpush.bf16.msrb.mxu1 %v1114_v60 }
 0x29e   : > { %v2476_v48 = vpop.eup %2475  ;;  %v1048_v63 = vmul.f32 0.5, %v1024_v26 }
 0x29f   : > { %v2478_v61 = vpop.eup %2477  ;;  %v1084_v62 = vmul.f32 0.5, %v2476_v48  ;;  %v1049_v2 = vmul.f32 0.5, %v1038_v58  ;;  %2243 = vmatmul.msk.bf16.vlgmr.msrb.gmra.mxu0 %vm510_vm2, %v2970_v25 }
 0x2a0   : > { %v1085_v43 = vmul.f32 0.5, %v2478_v61  ;;  %2244 = vmatmul.msk.bf16.vlgmr.msrb.gmra.mxu1 %vm510_vm2, %v2970_v25  ;;  %2479 = vtanh.f32 %v1048_v63 }
 0x2a1   : > { %v1100_v1 = vadd.f32 0.5, %v1084_v62  ;;  %2481 = vtanh.f32 %v1049_v2  ;;  %v3009_v62 = vld [vmem:[%s3202_s2 + $0x20] sm:$0xff] }
 0x2a2   : > { %v1101_v6 = vadd.f32 0.5, %v1085_v43 }
 0x2a3   : > { %v1111_v7 = vpack.c.bf16 %v1100_v1, %v1092_v0  ;;  %v1025_v49 = vpop.f32.mrf.mxu2 }
 0x2a4   : > { %v1112_v8 = vpack.c.bf16 %v1101_v6, %v1093_v4  ;;  %v1026_v9 = vadd.f32 %v1025_v49, %v2959_v55  ;;  %v1039_v10 = vpop.f32.mrf.mxu3 }
 0x2a5   : > { %v1040_v12 = vadd.f32 %v1039_v10, %v2959_v55  ;;  %1173 = vmatpush.bf16.msra.mxu2 %v1111_v7 }
 0x2a6   : > { %v1056_v13 = vmul.f32 0.5, %v1026_v9  ;;  %1187 = vmatpush.bf16.msra.mxu3 %v1112_v8  ;;  %v2480_v5 = vpop.eup %2479 }
 0x2a7   : > { %v1057_v14 = vmul.f32 0.5, %v1040_v12  ;;  %v2482_v15 = vpop.eup %2481  ;;  %v1080_v16 = vmul.f32 0.5, %v2480_v5 }
 0x2a8   : > { %2483 = vtanh.f32 %v1056_v13  ;;  %2241 = vmatmul.msk.bf16.vlgmr.msra.gmra.mxu2 %vm510_vm2, %v2970_v25  ;;  %v1081_v18 = vmul.f32 0.5, %v2482_v15 }
 0x2a9   : > { %2485 = vtanh.f32 %v1057_v14  ;;  %2242 = vmatmul.msk.bf16.vlgmr.msra.gmra.mxu3 %vm510_vm2, %v2970_v25  ;;  %v1096_v22 = vadd.f32 0.5, %v1080_v16 }
 0x2aa   : > { %v1097_v24 = vadd.f32 0.5, %v1081_v18 }
 0x2ae   : > { %v2484_v17 = vpop.eup %2483 }
 0x2af   : > { %v2486_v20 = vpop.eup %2485  ;;  %v1088_v21 = vmul.f32 0.5, %v2484_v17 }
 0x2b0   : > { %v1089_v55 = vmul.f32 0.5, %v2486_v20 }
 0x2b1   : > { %v1104_v23 = vadd.f32 0.5, %v1088_v21 }
 0x2b2   : > { %v1105_v27 = vadd.f32 0.5, %v1089_v55 }
 0x2b3   : > { %v1115_v28 = vpack.c.bf16 %v1104_v23, %v1096_v22 }
 0x2b4   : > { %v1116_v3 = vpack.c.bf16 %v1105_v27, %v1097_v24 }
 0x2b5   : > { %1229 = vmatpush.bf16.msrb.mxu2 %v1115_v28 }
 0x2b6   : > { %1243 = vmatpush.bf16.msrb.mxu3 %v1116_v3 }
 0x2b8   : > { %2245 = vmatmul.msk.bf16.vlgmr.msrb.gmra.mxu2 %vm510_vm2, %v2970_v25 }
 0x2b9   : > { %2246 = vmatmul.msk.bf16.vlgmr.msrb.gmra.mxu3 %vm510_vm2, %v2970_v25 }
 0x30c   : > { %v1147_v30 = vpop.f32.mrf.mxu0 }
 0x30d   : > { %v1148_v31 = vadd.f32 %v1147_v30, %v2996_v29  ;;  %v1161_v32 = vpop.f32.mrf.mxu1 }
 0x30e   : > { %v1162_v33 = vadd.f32 %v1161_v32, %v2996_v29 }
 0x30f   : > { %v1250_v19 = vmul.f32 0.5, %v1148_v31 }
 0x310   : > { %v1251_v34 = vmul.f32 0.5, %v1162_v33 }
 0x311   : > { %2487 = vtanh.f32 %v1250_v19 }
 0x312   : > { %2489 = vtanh.f32 %v1251_v34 }
 0x314   : > { %v1149_v35 = vpop.f32.mrf.mxu0 }
 0x315   : > { %v1150_v37 = vadd.f32 %v1149_v35, %v3000_v11  ;;  %v1163_v38 = vpop.f32.mrf.mxu1 }
 0x316   : > { %v1164_v25 = vadd.f32 %v1163_v38, %v3000_v11 }
 0x317   : > { %v1258_v39 = vmul.f32 0.5, %v1150_v37  ;;  %v2488_v36 = vpop.eup %2487 }
 0x318   : > { %v1259_v40 = vmul.f32 0.5, %v1164_v25  ;;  %v2490_v41 = vpop.eup %2489  ;;  %v1282_v42 = vmul.f32 0.5, %v2488_v36 }
 0x319   : > { %2491 = vtanh.f32 %v1258_v39  ;;  %v1283_v46 = vmul.f32 0.5, %v2490_v41 }
 0x31a   : > { %2493 = vtanh.f32 %v1259_v40  ;;  %v1298_v54 = vadd.f32 0.5, %v1282_v42 }
 0x31b   : > { %v1299_v57 = vadd.f32 0.5, %v1283_v46 }
 0x31c   : > { %v1203_v44 = vpop.f32.mrf.mxu0 }
 0x31d   : > { %v1204_v47 = vadd.f32 %v1203_v44, %v2996_v29  ;;  %v1217_v50 = vpop.f32.mrf.mxu1 }
 0x31e   : > { %v1218_v53 = vadd.f32 %v1217_v50, %v2996_v29 }
 0x31f   : > { %v2492_v45 = vpop.eup %2491  ;;  %v1254_v48 = vmul.f32 0.5, %v1204_v47 }
 0x320   : > { %v2494_v51 = vpop.eup %2493  ;;  %v1290_v52 = vmul.f32 0.5, %v2492_v45  ;;  %v1255_v60 = vmul.f32 0.5, %v1218_v53 }
 0x321   : > { %v1291_v26 = vmul.f32 0.5, %v2494_v51  ;;  %2495 = vtanh.f32 %v1254_v48 }
 0x322   : > { %v1306_v56 = vadd.f32 0.5, %v1290_v52  ;;  %2497 = vtanh.f32 %v1255_v60 }
 0x323   : > { %v1307_v58 = vadd.f32 0.5, %v1291_v26 }
 0x324   : > { %v1317_v59 = vpack.c.bf16 %v1306_v56, %v1298_v54  ;;  %v1205_v43 = vpop.f32.mrf.mxu0 }
 0x325   : > { %v1318_v61 = vpack.c.bf16 %v1307_v58, %v1299_v57  ;;  %v1206_v63 = vadd.f32 %v1205_v43, %v3000_v11  ;;  %v1219_v0 = vpop.f32.mrf.mxu1 }
 0x326   : > { %1353 = vmatpush.bf16.msra.mxu0 %v1317_v59  ;;  %v1220_v1 = vadd.f32 %v1219_v0, %v3000_v11 }
 0x327   : > { %1367 = vmatpush.bf16.msra.mxu1 %v1318_v61  ;;  %v1262_v2 = vmul.f32 0.5, %v1206_v63  ;;  %v2496_v9 = vpop.eup %2495 }
 0x328   : > { %v1263_v4 = vmul.f32 0.5, %v1220_v1  ;;  %v2498_v10 = vpop.eup %2497  ;;  %v1286_v13 = vmul.f32 0.5, %v2496_v9 }
 0x329   : > { %2255 = vmatmul.msk.bf16.vlgmr.msra.gmra.mxu0 %vm510_vm2, %v3009_v62  ;;  %2499 = vtanh.f32 %v1262_v2  ;;  %v1287_v15 = vmul.f32 0.5, %v2498_v10 }
 0x32a   : > { %2256 = vmatmul.msk.bf16.vlgmr.msra.gmra.mxu1 %vm510_vm2, %v3009_v62  ;;  %2501 = vtanh.f32 %v1263_v4  ;;  %v1302_v22 = vadd.f32 0.5, %v1286_v13 }
 0x32b   : > { %v1175_v6 = vpop.f32.mrf.mxu2  ;;  %v1303_v27 = vadd.f32 0.5, %v1287_v15  ;;  %v3041_v15 = vpop.permute.xlu2 %1335 }
 0x32c   : > { %v1176_v7 = vadd.f32 %v1175_v6, %v2996_v29  ;;  %v1189_v49 = vpop.f32.mrf.mxu3 }
 0x32d   : > { %v1190_v8 = vadd.f32 %v1189_v49, %v2996_v29 }
 0x32e   : > { %v1252_v12 = vmul.f32 0.5, %v1176_v7 }
 0x32f   : > { %v1253_v14 = vmul.f32 0.5, %v1190_v8  ;;  %v2500_v5 = vpop.eup %2499  ;;  %v3037_v8 = vpop.permute.xlu1 %1330 }
 0x330   : > { %v2502_v16 = vpop.eup %2501  ;;  %v1294_v17 = vmul.f32 0.5, %v2500_v5  ;;  %2503 = vtanh.f32 %v1252_v12 }
 0x331   : > { %v1295_v20 = vmul.f32 0.5, %v2502_v16  ;;  %2505 = vtanh.f32 %v1253_v14 }
 0x332   : > { %v1310_v23 = vadd.f32 0.5, %v1294_v17 }
 0x333   : > { %v1177_v18 = vpop.f32.mrf.mxu2  ;;  %v1311_v28 = vadd.f32 0.5, %v1295_v20 }
 0x334   : > { %v1178_v21 = vadd.f32 %v1177_v18, %v3000_v11  ;;  %v1191_v55 = vpop.f32.mrf.mxu3  ;;  %v1321_v30 = vpack.c.bf16 %v1310_v23, %v1302_v22 }
 0x335   : > { %v1192_v24 = vadd.f32 %v1191_v55, %v3000_v11  ;;  %v1322_v32 = vpack.c.bf16 %v1311_v28, %v1303_v27 }
 0x336   : > { %v1260_v3 = vmul.f32 0.5, %v1178_v21  ;;  %1409 = vmatpush.bf16.msrb.mxu0 %v1321_v30  ;;  %v2504_v33 = vpop.eup %2503 }
 0x337   : > { %v1261_v31 = vmul.f32 0.5, %v1192_v24  ;;  %1423 = vmatpush.bf16.msrb.mxu1 %v1322_v32  ;;  %v2506_v19 = vpop.eup %2505  ;;  %v1284_v38 = vmul.f32 0.5, %v2504_v33 }
 0x338   : > { %2507 = vtanh.f32 %v1260_v3  ;;  %v1285_v40 = vmul.f32 0.5, %v2506_v19 }
 0x339   : > { %2509 = vtanh.f32 %v1261_v31  ;;  %2259 = vmatmul.msk.bf16.vlgmr.msrb.gmra.mxu0 %vm510_vm2, %v3009_v62  ;;  %v1300_v45 = vadd.f32 0.5, %v1284_v38 }
 0x33a   : > { %2260 = vmatmul.msk.bf16.vlgmr.msrb.gmra.mxu1 %vm510_vm2, %v3009_v62  ;;  %v1301_v50 = vadd.f32 0.5, %v1285_v40 }
 0x33b   : > { %v1231_v34 = vpop.f32.mrf.mxu2 }
 0x33c   : > { %v1232_v35 = vadd.f32 %v1231_v34, %v2996_v29  ;;  %v1245_v37 = vpop.f32.mrf.mxu3 }
 0x33d   : > { %v1246_v25 = vadd.f32 %v1245_v37, %v2996_v29 }
 0x33e   : > { %v2508_v39 = vpop.eup %2507  ;;  %v1256_v44 = vmul.f32 0.5, %v1232_v35 }
 0x33f   : > { %v2510_v36 = vpop.eup %2509  ;;  %v1292_v41 = vmul.f32 0.5, %v2508_v39  ;;  %v1257_v47 = vmul.f32 0.5, %v1246_v25 }
 0x340   : > { %v1293_v42 = vmul.f32 0.5, %v2510_v36  ;;  %2511 = vtanh.f32 %v1256_v44 }
 0x341   : > { %v1308_v46 = vadd.f32 0.5, %v1292_v41  ;;  %2513 = vtanh.f32 %v1257_v47  ;;  %v3050_v41 = vld [vmem:[%s3202_s2 + $0x28] sm:$0xff] }
 0x342   : > { %v1309_v51 = vadd.f32 0.5, %v1293_v42 }
 0x343   : > { %v1319_v52 = vpack.c.bf16 %v1308_v46, %v1300_v45  ;;  %v1233_v53 = vpop.f32.mrf.mxu2 }
 0x344   : > { %v1320_v26 = vpack.c.bf16 %v1309_v51, %v1301_v50  ;;  %v1234_v54 = vadd.f32 %v1233_v53, %v3000_v11  ;;  %v1247_v56 = vpop.f32.mrf.mxu3 }
 0x345   : > { %v1248_v29 = vadd.f32 %v1247_v56, %v3000_v11  ;;  %1381 = vmatpush.bf16.msra.mxu2 %v1319_v52 }
 0x346   : > { %v1264_v57 = vmul.f32 0.5, %v1234_v54  ;;  %1395 = vmatpush.bf16.msra.mxu3 %v1320_v26  ;;  %v2512_v48 = vpop.eup %2511 }
 0x347   : > { %v1265_v58 = vmul.f32 0.5, %v1248_v29  ;;  %v2514_v59 = vpop.eup %2513  ;;  %v1288_v60 = vmul.f32 0.5, %v2512_v48 }
 0x348   : > { %2515 = vtanh.f32 %v1264_v57  ;;  %2257 = vmatmul.msk.bf16.vlgmr.msra.gmra.mxu2 %vm510_vm2, %v3009_v62  ;;  %v1289_v43 = vmul.f32 0.5, %v2514_v59 }
 0x349   : > { %2517 = vtanh.f32 %v1265_v58  ;;  %2258 = vmatmul.msk.bf16.vlgmr.msra.gmra.mxu3 %vm510_vm2, %v3009_v62  ;;  %v1304_v1 = vadd.f32 0.5, %v1288_v60 }
 0x34a   : > { %v1305_v4 = vadd.f32 0.5, %v1289_v43 }
 0x34e   : > { %v2516_v61 = vpop.eup %2515 }
 0x34f   : > { %v2518_v63 = vpop.eup %2517  ;;  %v1296_v0 = vmul.f32 0.5, %v2516_v61 }
 0x350   : > { %v1297_v11 = vmul.f32 0.5, %v2518_v63 }
 0x351   : > { %v1312_v2 = vadd.f32 0.5, %v1296_v0 }
 0x352   : > { %v1313_v6 = vadd.f32 0.5, %v1297_v11 }
 0x353   : > { %v1323_v7 = vpack.c.bf16 %v1312_v2, %v1304_v1 }
 0x354   : > { %v1324_v49 = vpack.c.bf16 %v1313_v6, %v1305_v4 }
 0x355   : > { %1437 = vmatpush.bf16.msrb.mxu2 %v1323_v7 }
 0x356   : > { %1451 = vmatpush.bf16.msrb.mxu3 %v1324_v49 }
 0x358   : > { %2261 = vmatmul.msk.bf16.vlgmr.msrb.gmra.mxu2 %vm510_vm2, %v3009_v62 }
 0x359   : > { %2262 = vmatmul.msk.bf16.vlgmr.msrb.gmra.mxu3 %vm510_vm2, %v3009_v62 }
 0x3a6   : > { %v1355_v9 = vpop.f32.mrf.mxu0 }
 0x3a7   : > { %v1356_v10 = vadd.f32 %v1355_v9, %v3037_v8  ;;  %v1369_v12 = vpop.f32.mrf.mxu1 }
 0x3a8   : > { %v1370_v13 = vadd.f32 %v1369_v12, %v3037_v8 }
 0x3a9   : > { %v1458_v14 = vmul.f32 0.5, %v1356_v10 }
 0x3aa   : > { %v1459_v5 = vmul.f32 0.5, %v1370_v13 }
 0x3ab   : > { %2519 = vtanh.f32 %v1458_v14 }
 0x3ac   : > { %2521 = vtanh.f32 %v1459_v5 }
 0x3ae   : > { %v1357_v16 = vpop.f32.mrf.mxu0 }
 0x3af   : > { %v1358_v17 = vadd.f32 %v1357_v16, %v3041_v15  ;;  %v1371_v18 = vpop.f32.mrf.mxu1 }
 0x3b0   : > { %v1372_v62 = vadd.f32 %v1371_v18, %v3041_v15 }
 0x3b1   : > { %v1466_v20 = vmul.f32 0.5, %v1358_v17  ;;  %v2520_v55 = vpop.eup %2519 }
 0x3b2   : > { %v1467_v21 = vmul.f32 0.5, %v1372_v62  ;;  %v2522_v22 = vpop.eup %2521  ;;  %v1490_v23 = vmul.f32 0.5, %v2520_v55 }
 0x3b3   : > { %2523 = vtanh.f32 %v1466_v20  ;;  %v1491_v28 = vmul.f32 0.5, %v2522_v22 }
 0x3b4   : > { %2525 = vtanh.f32 %v1467_v21  ;;  %v1506_v34 = vadd.f32 0.5, %v1490_v23 }
 0x3b5   : > { %v1507_v37 = vadd.f32 0.5, %v1491_v28 }
 0x3b6   : > { %v1411_v24 = vpop.f32.mrf.mxu0 }
 0x3b7   : > { %v1412_v3 = vadd.f32 %v1411_v24, %v3037_v8  ;;  %v1425_v30 = vpop.f32.mrf.mxu1 }
 0x3b8   : > { %v1426_v33 = vadd.f32 %v1425_v30, %v3037_v8 }
 0x3b9   : > { %v2524_v27 = vpop.eup %2523  ;;  %v1462_v25 = vmul.f32 0.5, %v1412_v3 }
 0x3ba   : > { %v2526_v31 = vpop.eup %2525  ;;  %v1498_v32 = vmul.f32 0.5, %v2524_v27  ;;  %v1463_v40 = vmul.f32 0.5, %v1426_v33 }
 0x3bb   : > { %v1499_v19 = vmul.f32 0.5, %v2526_v31  ;;  %2527 = vtanh.f32 %v1462_v25 }
 0x3bc   : > { %v1514_v35 = vadd.f32 0.5, %v1498_v32  ;;  %2529 = vtanh.f32 %v1463_v40 }
 0x3bd   : > { %v1515_v38 = vadd.f32 0.5, %v1499_v19 }
 0x3be   : > { %v1525_v39 = vpack.c.bf16 %v1514_v35, %v1506_v34  ;;  %v1413_v42 = vpop.f32.mrf.mxu0 }
 0x3bf   : > { %v1526_v36 = vpack.c.bf16 %v1515_v38, %v1507_v37  ;;  %v1414_v44 = vadd.f32 %v1413_v42, %v3041_v15  ;;  %v1427_v45 = vpop.f32.mrf.mxu1 }
 0x3c0   : > { %1561 = vmatpush.bf16.msra.mxu0 %v1525_v39  ;;  %v1428_v46 = vadd.f32 %v1427_v45, %v3041_v15 }
 0x3c1   : > { %1575 = vmatpush.bf16.msra.mxu1 %v1526_v36  ;;  %v1470_v47 = vmul.f32 0.5, %v1414_v44  ;;  %v2528_v51 = vpop.eup %2527 }
 0x3c2   : > { %v1471_v50 = vmul.f32 0.5, %v1428_v46  ;;  %v2530_v52 = vpop.eup %2529  ;;  %v1494_v53 = vmul.f32 0.5, %v2528_v51 }
 0x3c3   : > { %2271 = vmatmul.msk.bf16.vlgmr.msra.gmra.mxu0 %vm510_vm2, %v3050_v41  ;;  %2531 = vtanh.f32 %v1470_v47  ;;  %v1495_v56 = vmul.f32 0.5, %v2530_v52 }
 0x3c4   : > { %2272 = vmatmul.msk.bf16.vlgmr.msra.gmra.mxu1 %vm510_vm2, %v3050_v41  ;;  %2533 = vtanh.f32 %v1471_v50  ;;  %v1510_v61 = vadd.f32 0.5, %v1494_v53 }
 0x3c5   : > { %v1511_v63 = vadd.f32 0.5, %v1495_v56 }
 0x3c9   : > { %v2532_v54 = vpop.eup %2531 }
 0x3ca   : > { %v2534_v58 = vpop.eup %2533  ;;  %v1502_v48 = vmul.f32 0.5, %v2532_v54 }
 0x3cb   : > { %v1383_v26 = vpop.f32.mrf.mxu2  ;;  %v1503_v60 = vmul.f32 0.5, %v2534_v58 }
 0x3cc   : > { %v1384_v29 = vadd.f32 %v1383_v26, %v3037_v8  ;;  %v1397_v57 = vpop.f32.mrf.mxu3  ;;  %v1518_v43 = vadd.f32 0.5, %v1502_v48  ;;  %v3078_v26 = vpop.permute.xlu0 %1538 }
 0x3cd   : > { %v1398_v59 = vadd.f32 %v1397_v57, %v3037_v8  ;;  %v1519_v0 = vadd.f32 0.5, %v1503_v60 }
 0x3ce   : > { %v1460_v11 = vmul.f32 0.5, %v1384_v29  ;;  %v1529_v1 = vpack.c.bf16 %v1518_v43, %v1510_v61 }
 0x3cf   : > { %v1461_v2 = vmul.f32 0.5, %v1398_v59  ;;  %v1530_v4 = vpack.c.bf16 %v1519_v0, %v1511_v63  ;;  %v3082_v59 = vpop.permute.xlu1 %1543 }
 0x3d0   : > { %1617 = vmatpush.bf16.msrb.mxu0 %v1529_v1  ;;  %2535 = vtanh.f32 %v1460_v11 }
 0x3d1   : > { %1631 = vmatpush.bf16.msrb.mxu1 %v1530_v4  ;;  %2537 = vtanh.f32 %v1461_v2 }
 0x3d3   : > { %v1385_v6 = vpop.f32.mrf.mxu2  ;;  %2275 = vmatmul.msk.bf16.vlgmr.msrb.gmra.mxu0 %vm510_vm2, %v3050_v41 }
 0x3d4   : > { %v1386_v7 = vadd.f32 %v1385_v6, %v3041_v15  ;;  %v1399_v49 = vpop.f32.mrf.mxu3  ;;  %2276 = vmatmul.msk.bf16.vlgmr.msrb.gmra.mxu1 %vm510_vm2, %v3050_v41 }
 0x3d5   : > { %v1400_v9 = vadd.f32 %v1399_v49, %v3041_v15 }
 0x3d6   : > { %v1468_v10 = vmul.f32 0.5, %v1386_v7  ;;  %v2536_v13 = vpop.eup %2535 }
 0x3d7   : > { %v1469_v12 = vmul.f32 0.5, %v1400_v9  ;;  %v2538_v14 = vpop.eup %2537  ;;  %v1492_v18 = vmul.f32 0.5, %v2536_v13 }
 0x3d8   : > { %2539 = vtanh.f32 %v1468_v10  ;;  %v1493_v21 = vmul.f32 0.5, %v2538_v14 }
 0x3d9   : > { %2541 = vtanh.f32 %v1469_v12  ;;  %v1508_v27 = vadd.f32 0.5, %v1492_v18 }
 0x3da   : > { %v1509_v30 = vadd.f32 0.5, %v1493_v21 }
 0x3db   : > { %v1439_v5 = vpop.f32.mrf.mxu2 }
 0x3dc   : > { %v1440_v16 = vadd.f32 %v1439_v5, %v3037_v8  ;;  %v1453_v17 = vpop.f32.mrf.mxu3 }
 0x3dd   : > { %v1454_v62 = vadd.f32 %v1453_v17, %v3037_v8 }
 0x3de   : > { %v2540_v20 = vpop.eup %2539  ;;  %v1464_v24 = vmul.f32 0.5, %v1440_v16 }
 0x3df   : > { %v2542_v55 = vpop.eup %2541  ;;  %v1500_v22 = vmul.f32 0.5, %v2540_v20  ;;  %v1465_v3 = vmul.f32 0.5, %v1454_v62 }
 0x3e0   : > { %v1501_v23 = vmul.f32 0.5, %v2542_v55  ;;  %2543 = vtanh.f32 %v1464_v24 }
 0x3e1   : > { %v1516_v28 = vadd.f32 0.5, %v1500_v22  ;;  %2545 = vtanh.f32 %v1465_v3  ;;  %v3091_v22 = vld [vmem:[%s3202_s2 + $0x30] sm:$0xff] }
 0x3e2   : > { %v1517_v31 = vadd.f32 0.5, %v1501_v23 }
 0x3e3   : > { %v1527_v32 = vpack.c.bf16 %v1516_v28, %v1508_v27  ;;  %v1441_v33 = vpop.f32.mrf.mxu2 }
 0x3e4   : > { %v1528_v19 = vpack.c.bf16 %v1517_v31, %v1509_v30  ;;  %v1442_v34 = vadd.f32 %v1441_v33, %v3041_v15  ;;  %v1455_v35 = vpop.f32.mrf.mxu3 }
 0x3e5   : > { %v1456_v8 = vadd.f32 %v1455_v35, %v3041_v15  ;;  %1589 = vmatpush.bf16.msra.mxu2 %v1527_v32 }
 0x3e6   : > { %v1472_v37 = vmul.f32 0.5, %v1442_v34  ;;  %1603 = vmatpush.bf16.msra.mxu3 %v1528_v19  ;;  %v2544_v25 = vpop.eup %2543 }
 0x3e7   : > { %v1473_v38 = vmul.f32 0.5, %v1456_v8  ;;  %v2546_v39 = vpop.eup %2545  ;;  %v1496_v40 = vmul.f32 0.5, %v2544_v25 }
 0x3e8   : > { %2547 = vtanh.f32 %v1472_v37  ;;  %2273 = vmatmul.msk.bf16.vlgmr.msra.gmra.mxu2 %vm510_vm2, %v3050_v41  ;;  %v1497_v42 = vmul.f32 0.5, %v2546_v39 }
 0x3e9   : > { %2549 = vtanh.f32 %v1473_v38  ;;  %2274 = vmatmul.msk.bf16.vlgmr.msra.gmra.mxu3 %vm510_vm2, %v3050_v41  ;;  %v1512_v46 = vadd.f32 0.5, %v1496_v40 }
 0x3ea   : > { %v1513_v50 = vadd.f32 0.5, %v1497_v42 }
 0x3ee   : > { %v2548_v36 = vpop.eup %2547 }
 0x3ef   : > { %v2550_v44 = vpop.eup %2549  ;;  %v1504_v45 = vmul.f32 0.5, %v2548_v36 }
 0x3f0   : > { %v1505_v15 = vmul.f32 0.5, %v2550_v44 }
 0x3f1   : > { %v1520_v47 = vadd.f32 0.5, %v1504_v45 }
 0x3f2   : > { %v1521_v51 = vadd.f32 0.5, %v1505_v15 }
 0x3f3   : > { %v1531_v52 = vpack.c.bf16 %v1520_v47, %v1512_v46 }
 0x3f4   : > { %v1532_v53 = vpack.c.bf16 %v1521_v51, %v1513_v50 }
 0x3f5   : > { %1645 = vmatpush.bf16.msrb.mxu2 %v1531_v52 }
 0x3f6   : > { %1659 = vmatpush.bf16.msrb.mxu3 %v1532_v53 }
 0x3f8   : > { %2277 = vmatmul.msk.bf16.vlgmr.msrb.gmra.mxu2 %vm510_vm2, %v3050_v41 }
 0x3f9   : > { %2278 = vmatmul.msk.bf16.vlgmr.msrb.gmra.mxu3 %vm510_vm2, %v3050_v41 }
 0x440   : > { %v1563_v54 = vpop.f32.mrf.mxu0 }
 0x441   : > { %v1564_v56 = vadd.f32 %v1563_v54, %v3078_v26  ;;  %v1577_v29 = vpop.f32.mrf.mxu1 }
 0x442   : > { %v1578_v57 = vadd.f32 %v1577_v29, %v3078_v26 }
 0x443   : > { %v1666_v58 = vmul.f32 0.5, %v1564_v56 }
 0x444   : > { %v1667_v48 = vmul.f32 0.5, %v1578_v57 }
 0x445   : > { %2551 = vtanh.f32 %v1666_v58 }
 0x446   : > { %2553 = vtanh.f32 %v1667_v48 }
 0x448   : > { %v1565_v60 = vpop.f32.mrf.mxu0 }
 0x449   : > { %v1566_v61 = vadd.f32 %v1565_v60, %v3082_v59  ;;  %v1579_v43 = vpop.f32.mrf.mxu1 }
 0x44a   : > { %v1580_v41 = vadd.f32 %v1579_v43, %v3082_v59 }
 0x44b   : > { %v1674_v63 = vmul.f32 0.5, %v1566_v61  ;;  %v2552_v11 = vpop.eup %2551 }
 0x44c   : > { %v1675_v0 = vmul.f32 0.5, %v1580_v41  ;;  %v2554_v1 = vpop.eup %2553  ;;  %v1698_v2 = vmul.f32 0.5, %v2552_v11 }
 0x44d   : > { %2555 = vtanh.f32 %v1674_v63  ;;  %v1699_v7 = vmul.f32 0.5, %v2554_v1 }
 0x44e   : > { %2557 = vtanh.f32 %v1675_v0  ;;  %v1714_v5 = vadd.f32 0.5, %v1698_v2 }
 0x44f   : > { %v1715_v17 = vadd.f32 0.5, %v1699_v7 }
 0x450   : > { %v1619_v4 = vpop.f32.mrf.mxu0 }
 0x451   : > { %v1620_v49 = vadd.f32 %v1619_v4, %v3078_v26  ;;  %v1633_v9 = vpop.f32.mrf.mxu1 }
 0x452   : > { %v1634_v13 = vadd.f32 %v1633_v9, %v3078_v26 }
 0x453   : > { %v2556_v6 = vpop.eup %2555  ;;  %v1670_v62 = vmul.f32 0.5, %v1620_v49 }
 0x454   : > { %v2558_v10 = vpop.eup %2557  ;;  %v1706_v12 = vmul.f32 0.5, %v2556_v6  ;;  %v1671_v21 = vmul.f32 0.5, %v1634_v13 }
 0x455   : > { %v1707_v14 = vmul.f32 0.5, %v2558_v10  ;;  %2559 = vtanh.f32 %v1670_v62 }
 0x456   : > { %v1722_v16 = vadd.f32 0.5, %v1706_v12  ;;  %2561 = vtanh.f32 %v1671_v21 }
 0x457   : > { %v1723_v18 = vadd.f32 0.5, %v1707_v14 }
 0x458   : > { %v1733_v20 = vpack.c.bf16 %v1722_v16, %v1714_v5  ;;  %v1621_v23 = vpop.f32.mrf.mxu0 }
 0x459   : > { %v1734_v55 = vpack.c.bf16 %v1723_v18, %v1715_v17  ;;  %v1622_v24 = vadd.f32 %v1621_v23, %v3082_v59  ;;  %v1635_v27 = vpop.f32.mrf.mxu1 }
 0x45a   : > { %1769 = vmatpush.bf16.msra.mxu0 %v1733_v20  ;;  %v1636_v28 = vadd.f32 %v1635_v27, %v3082_v59 }
 0x45b   : > { %1783 = vmatpush.bf16.msra.mxu1 %v1734_v55  ;;  %v1678_v3 = vmul.f32 0.5, %v1622_v24  ;;  %v2560_v31 = vpop.eup %2559 }
 0x45c   : > { %v1679_v30 = vmul.f32 0.5, %v1636_v28  ;;  %v2562_v32 = vpop.eup %2561  ;;  %v1702_v33 = vmul.f32 0.5, %v2560_v31 }
 0x45d   : > { %2287 = vmatmul.msk.bf16.vlgmr.msra.gmra.mxu0 %vm510_vm2, %v3091_v22  ;;  %2563 = vtanh.f32 %v1678_v3  ;;  %v1703_v34 = vmul.f32 0.5, %v2562_v32 }
 0x45e   : > { %2288 = vmatmul.msk.bf16.vlgmr.msra.gmra.mxu1 %vm510_vm2, %v3091_v22  ;;  %2565 = vtanh.f32 %v1679_v30  ;;  %v1718_v38 = vadd.f32 0.5, %v1702_v33 }
 0x45f   : > { %v1719_v39 = vadd.f32 0.5, %v1703_v34 }
 0x463   : > { %v2564_v19 = vpop.eup %2563 }
 0x464   : > { %v2566_v35 = vpop.eup %2565  ;;  %v1710_v8 = vmul.f32 0.5, %v2564_v19  ;;  %v3119_v19 = vpop.permute.xlu2 %1746 }
 0x465   : > { %v1711_v37 = vmul.f32 0.5, %v2566_v35 }
 0x466   : > { %v1726_v25 = vadd.f32 0.5, %v1710_v8 }
 0x467   : > { %v1727_v40 = vadd.f32 0.5, %v1711_v37 }
 0x468   : > { %v1737_v36 = vpack.c.bf16 %v1726_v25, %v1718_v38 }
 0x469   : > { %v1738_v44 = vpack.c.bf16 %v1727_v40, %v1719_v39  ;;  %v3123_v39 = vpop.permute.xlu0 %1751 }
 0x46a   : > { %1825 = vmatpush.bf16.msrb.mxu0 %v1737_v36 }
 0x46b   : > { %v1591_v42 = vpop.f32.mrf.mxu2  ;;  %1839 = vmatpush.bf16.msrb.mxu1 %v1738_v44 }
 0x46c   : > { %v1592_v45 = vadd.f32 %v1591_v42, %v3078_v26  ;;  %v1605_v15 = vpop.f32.mrf.mxu3 }
 0x46d   : > { %v1606_v46 = vadd.f32 %v1605_v15, %v3078_v26  ;;  %2291 = vmatmul.msk.bf16.vlgmr.msrb.gmra.mxu0 %vm510_vm2, %v3091_v22 }
 0x46e   : > { %v1668_v47 = vmul.f32 0.5, %v1592_v45  ;;  %2292 = vmatmul.msk.bf16.vlgmr.msrb.gmra.mxu1 %vm510_vm2, %v3091_v22 }
 0x46f   : > { %v1669_v50 = vmul.f32 0.5, %v1606_v46 }
 0x470   : > { %2567 = vtanh.f32 %v1668_v47 }
 0x471   : > { %2569 = vtanh.f32 %v1669_v50 }
 0x473   : > { %v1593_v51 = vpop.f32.mrf.mxu2 }
 0x474   : > { %v1594_v52 = vadd.f32 %v1593_v51, %v3082_v59  ;;  %v1607_v53 = vpop.f32.mrf.mxu3 }
 0x475   : > { %v1608_v54 = vadd.f32 %v1607_v53, %v3082_v59 }
 0x476   : > { %v1676_v56 = vmul.f32 0.5, %v1594_v52  ;;  %v2568_v57 = vpop.eup %2567 }
 0x477   : > { %v1677_v29 = vmul.f32 0.5, %v1608_v54  ;;  %v2570_v58 = vpop.eup %2569  ;;  %v1700_v43 = vmul.f32 0.5, %v2568_v57 }
 0x478   : > { %2571 = vtanh.f32 %v1676_v56  ;;  %v1701_v0 = vmul.f32 0.5, %v2570_v58 }
 0x479   : > { %2573 = vtanh.f32 %v1677_v29  ;;  %v1716_v6 = vadd.f32 0.5, %v1700_v43 }
 0x47a   : > { %v1717_v9 = vadd.f32 0.5, %v1701_v0 }
 0x47b   : > { %v1647_v48 = vpop.f32.mrf.mxu2 }
 0x47c   : > { %v1648_v60 = vadd.f32 %v1647_v48, %v3078_v26  ;;  %v1661_v61 = vpop.f32.mrf.mxu3 }
 0x47d   : > { %v1662_v41 = vadd.f32 %v1661_v61, %v3078_v26 }
 0x47e   : > { %v2572_v63 = vpop.eup %2571  ;;  %v1672_v4 = vmul.f32 0.5, %v1648_v60 }
 0x47f   : > { %v2574_v11 = vpop.eup %2573  ;;  %v1708_v1 = vmul.f32 0.5, %v2572_v63  ;;  %v1673_v49 = vmul.f32 0.5, %v1662_v41 }
 0x480   : > { %v1709_v2 = vmul.f32 0.5, %v2574_v11  ;;  %2575 = vtanh.f32 %v1672_v4 }
 0x481   : > { %v1724_v7 = vadd.f32 0.5, %v1708_v1  ;;  %2577 = vtanh.f32 %v1673_v49 }
 0x482   : > { %v1725_v10 = vadd.f32 0.5, %v1709_v2  ;;  %v3132_v2 = vld [vmem:[%s3203_s3] sm:$0xf] }
 0x483   : > { %v1735_v12 = vpack.c.bf16 %v1724_v7, %v1716_v6  ;;  %v1649_v13 = vpop.f32.mrf.mxu2 }
 0x484   : > { %v1736_v14 = vpack.c.bf16 %v1725_v10, %v1717_v9  ;;  %v1650_v5 = vadd.f32 %v1649_v13, %v3082_v59  ;;  %v1663_v16 = vpop.f32.mrf.mxu3 }
 0x485   : > { %v1664_v26 = vadd.f32 %v1663_v16, %v3082_v59  ;;  %1797 = vmatpush.bf16.msra.mxu2 %v1735_v12 }
 0x486   : > { %v1680_v17 = vmul.f32 0.5, %v1650_v5  ;;  %1811 = vmatpush.bf16.msra.mxu3 %v1736_v14  ;;  %v2576_v62 = vpop.eup %2575 }
 0x487   : > { %v1681_v18 = vmul.f32 0.5, %v1664_v26  ;;  %v2578_v20 = vpop.eup %2577  ;;  %v1704_v21 = vmul.f32 0.5, %v2576_v62 }
 0x488   : > { %2579 = vtanh.f32 %v1680_v17  ;;  %2289 = vmatmul.msk.bf16.vlgmr.msra.gmra.mxu2 %vm510_vm2, %v3091_v22  ;;  %v1705_v23 = vmul.f32 0.5, %v2578_v20 }
 0x489   : > { %2581 = vtanh.f32 %v1681_v18  ;;  %2290 = vmatmul.msk.bf16.vlgmr.msra.gmra.mxu3 %vm510_vm2, %v3091_v22  ;;  %v1720_v28 = vadd.f32 0.5, %v1704_v21 }
 0x48a   : > { %v1721_v30 = vadd.f32 0.5, %v1705_v23 }
 0x48e   : > { %v2580_v55 = vpop.eup %2579 }
 0x48f   : > { %v2582_v24 = vpop.eup %2581  ;;  %v1712_v27 = vmul.f32 0.5, %v2580_v55 }
 0x490   : > { %v1713_v59 = vmul.f32 0.5, %v2582_v24 }
 0x491   : > { %v1728_v3 = vadd.f32 0.5, %v1712_v27 }
 0x492   : > { %v1729_v31 = vadd.f32 0.5, %v1713_v59 }
 0x493   : > { %v1739_v32 = vpack.c.bf16 %v1728_v3, %v1720_v28 }
 0x494   : > { %v1740_v33 = vpack.c.bf16 %v1729_v31, %v1721_v30 }
 0x495   : > { %1853 = vmatpush.bf16.msrb.mxu2 %v1739_v32 }
 0x496   : > { %1867 = vmatpush.bf16.msrb.mxu3 %v1740_v33 }
 0x498   : > { %2293 = vmatmul.msk.bf16.vlgmr.msrb.gmra.mxu2 %vm510_vm2, %v3091_v22 }
 0x499   : > { %2294 = vmatmul.msk.bf16.vlgmr.msrb.gmra.mxu3 %vm510_vm2, %v3091_v22 }
 0x4da   : > { %v1771_v34 = vpop.f32.mrf.mxu0 }
 0x4db   : > { %v1772_v35 = vadd.f32 %v1771_v34, %v3119_v19  ;;  %v1785_v8 = vpop.f32.mrf.mxu1 }
 0x4dc   : > { %v1786_v37 = vadd.f32 %v1785_v8, %v3119_v19 }
 0x4dd   : > { %v1874_v38 = vmul.f32 0.5, %v1772_v35 }
 0x4de   : > { %v1875_v25 = vmul.f32 0.5, %v1786_v37 }
 0x4df   : > { %2583 = vtanh.f32 %v1874_v38 }
 0x4e0   : > { %2585 = vtanh.f32 %v1875_v25 }
 0x4e2   : > { %v1773_v40 = vpop.f32.mrf.mxu0 }
 0x4e3   : > { %v1774_v36 = vadd.f32 %v1773_v40, %v3123_v39  ;;  %v1787_v42 = vpop.f32.mrf.mxu1 }
 0x4e4   : > { %v1788_v22 = vadd.f32 %v1787_v42, %v3123_v39 }
 0x4e5   : > { %v1882_v44 = vmul.f32 0.5, %v1774_v36  ;;  %v2584_v15 = vpop.eup %2583 }
 0x4e6   : > { %v1883_v45 = vmul.f32 0.5, %v1788_v22  ;;  %v2586_v46 = vpop.eup %2585  ;;  %v1906_v47 = vmul.f32 0.5, %v2584_v15 }
 0x4e7   : > { %2587 = vtanh.f32 %v1882_v44  ;;  %v1907_v52 = vmul.f32 0.5, %v2586_v46 }
 0x4e8   : > { %2589 = vtanh.f32 %v1883_v45  ;;  %v1922_v48 = vadd.f32 0.5, %v1906_v47 }
 0x4e9   : > { %v1923_v61 = vadd.f32 0.5, %v1907_v52 }
 0x4ea   : > { %v1827_v50 = vpop.f32.mrf.mxu0 }
 0x4eb   : > { %v1828_v53 = vadd.f32 %v1827_v50, %v3119_v19  ;;  %v1841_v54 = vpop.f32.mrf.mxu1 }
 0x4ec   : > { %v1842_v57 = vadd.f32 %v1841_v54, %v3119_v19 }
 0x4ed   : > { %v2588_v51 = vpop.eup %2587  ;;  %v1878_v41 = vmul.f32 0.5, %v1828_v53 }
 0x4ee   : > { %v2590_v56 = vpop.eup %2589  ;;  %v1914_v29 = vmul.f32 0.5, %v2588_v51  ;;  %v1879_v0 = vmul.f32 0.5, %v1842_v57 }
 0x4ef   : > { %v1915_v58 = vmul.f32 0.5, %v2590_v56  ;;  %2591 = vtanh.f32 %v1878_v41 }
 0x4f0   : > { %v1930_v60 = vadd.f32 0.5, %v1914_v29  ;;  %2593 = vtanh.f32 %v1879_v0 }
 0x4f1   : > { %v1931_v43 = vadd.f32 0.5, %v1915_v58 }
 0x4f2   : > { %v1939_v63 = vpack.c.bf16 %v1930_v60, %v1922_v48  ;;  %v1829_v1 = vpop.f32.mrf.mxu0 }
 0x4f3   : > { %v1940_v11 = vpack.c.bf16 %v1931_v43, %v1923_v61  ;;  %v1830_v4 = vadd.f32 %v1829_v1, %v3123_v39  ;;  %v1843_v6 = vpop.f32.mrf.mxu1 }
 0x4f4   : > { %1964 = vmatpush.bf16.msra.mxu0 %v1939_v63  ;;  %v1844_v7 = vadd.f32 %v1843_v6, %v3123_v39 }
 0x4f5   : > { %1977 = vmatpush.bf16.msra.mxu1 %v1940_v11  ;;  %v1886_v49 = vmul.f32 0.5, %v1830_v4  ;;  %v2592_v10 = vpop.eup %2591 }
 0x4f6   : > { %v1887_v9 = vmul.f32 0.5, %v1844_v7  ;;  %v2594_v12 = vpop.eup %2593  ;;  %v1910_v13 = vmul.f32 0.5, %v2592_v10 }
 0x4f7   : > { %2296 = vmatmul.msk.bf16.vlgmr.msra.gmra.mxu0 %vm510_vm2, %v3132_v2  ;;  %2595 = vtanh.f32 %v1886_v49  ;;  %v1911_v5 = vmul.f32 0.5, %v2594_v12 }
 0x4f8   : > { %2297 = vmatmul.msk.bf16.vlgmr.msra.gmra.mxu1 %vm510_vm2, %v3132_v2  ;;  %2597 = vtanh.f32 %v1887_v9  ;;  %v1926_v18 = vadd.f32 0.5, %v1910_v13 }
 0x4f9   : > { %v1927_v20 = vadd.f32 0.5, %v1911_v5  ;;  %v1952_v5 = vpop.permute.xlu1 %1951 }
 0x4fd   : > { %v2596_v14 = vpop.eup %2595 }
 0x4fe   : > { %v2598_v16 = vpop.eup %2597  ;;  %v1918_v26 = vmul.f32 0.5, %v2596_v14 }
 0x4ff   : > { %v1919_v17 = vmul.f32 0.5, %v2598_v16 }
 0x500   : > { %v1934_v62 = vadd.f32 0.5, %v1918_v26 }
 0x501   : > { %v1935_v21 = vadd.f32 0.5, %v1919_v17 }
 0x502   : > { %v1943_v55 = vpack.c.bf16 %v1934_v62, %v1926_v18 }
 0x503   : > { %v1944_v23 = vpack.c.bf16 %v1935_v21, %v1927_v20 }
 0x504   : > { %2016 = vmatpush.bf16.msrb.mxu0 %v1943_v55 }
 0x505   : > { %2029 = vmatpush.bf16.msrb.mxu1 %v1944_v23 }
 0x507   : > { %2300 = vmatmul.msk.bf16.vlgmr.msrb.gmra.mxu0 %vm510_vm2, %v3132_v2 }
 0x508   : > { %2301 = vmatmul.msk.bf16.vlgmr.msrb.gmra.mxu1 %vm510_vm2, %v3132_v2 }
 0x50b   : > { %v1799_v24 = vpop.f32.mrf.mxu2 }
 0x50c   : > { %v1800_v27 = vadd.f32 %v1799_v24, %v3119_v19  ;;  %v1813_v59 = vpop.f32.mrf.mxu3 }
 0x50d   : > { %v1814_v28 = vadd.f32 %v1813_v59, %v3119_v19 }
 0x50e   : > { %v1876_v3 = vmul.f32 0.5, %v1800_v27 }
 0x50f   : > { %v1877_v30 = vmul.f32 0.5, %v1814_v28 }
 0x510   : > { %2599 = vtanh.f32 %v1876_v3 }
 0x511   : > { %2601 = vtanh.f32 %v1877_v30 }
 0x513   : > { %v1801_v31 = vpop.f32.mrf.mxu2 }
 0x514   : > { %v1802_v32 = vadd.f32 %v1801_v31, %v3123_v39  ;;  %v1815_v33 = vpop.f32.mrf.mxu3 }
 0x515   : > { %v1816_v34 = vadd.f32 %v1815_v33, %v3123_v39 }
 0x516   : > { %v1884_v35 = vmul.f32 0.5, %v1802_v32  ;;  %v2600_v37 = vpop.eup %2599 }
 0x517   : > { %v1885_v8 = vmul.f32 0.5, %v1816_v34  ;;  %v2602_v38 = vpop.eup %2601  ;;  %v1908_v42 = vmul.f32 0.5, %v2600_v37 }
 0x518   : > { %2603 = vtanh.f32 %v1884_v35  ;;  %v1909_v45 = vmul.f32 0.5, %v2602_v38 }
 0x519   : > { %2605 = vtanh.f32 %v1885_v8  ;;  %v1924_v51 = vadd.f32 0.5, %v1908_v42 }
 0x51a   : > { %v1925_v54 = vadd.f32 0.5, %v1909_v45 }
 0x51b   : > { %v1855_v25 = vpop.f32.mrf.mxu2 }
 0x51c   : > { %v1856_v40 = vadd.f32 %v1855_v25, %v3119_v19  ;;  %v1869_v36 = vpop.f32.mrf.mxu3 }
 0x51d   : > { %v1870_v22 = vadd.f32 %v1869_v36, %v3119_v19 }
 0x51e   : > { %v2604_v44 = vpop.eup %2603  ;;  %v1880_v50 = vmul.f32 0.5, %v1856_v40 }
 0x51f   : > { %v2606_v15 = vpop.eup %2605  ;;  %v1916_v46 = vmul.f32 0.5, %v2604_v44  ;;  %v1881_v53 = vmul.f32 0.5, %v1870_v22 }
 0x520   : > { %v1917_v47 = vmul.f32 0.5, %v2606_v15  ;;  %2607 = vtanh.f32 %v1880_v50 }
 0x521   : > { %v1932_v52 = vadd.f32 0.5, %v1916_v46  ;;  %2609 = vtanh.f32 %v1881_v53 }
 0x522   : > { %v1933_v56 = vadd.f32 0.5, %v1917_v47 }
 0x523   : > { %v1941_v29 = vpack.c.bf16 %v1932_v52, %v1924_v51  ;;  %v1857_v57 = vpop.f32.mrf.mxu2 }
 0x524   : > { %v1942_v58 = vpack.c.bf16 %v1933_v56, %v1925_v54  ;;  %v1858_v48 = vadd.f32 %v1857_v57, %v3123_v39  ;;  %v1871_v60 = vpop.f32.mrf.mxu3 }
 0x525   : > { %v1872_v19 = vadd.f32 %v1871_v60, %v3123_v39  ;;  %1990 = vmatpush.bf16.msra.mxu2 %v1941_v29 }
 0x526   : > { %v1888_v61 = vmul.f32 0.5, %v1858_v48  ;;  %2003 = vmatpush.bf16.msra.mxu3 %v1942_v58  ;;  %v2608_v41 = vpop.eup %2607 }
 0x527   : > { %v1889_v43 = vmul.f32 0.5, %v1872_v19  ;;  %v2610_v63 = vpop.eup %2609  ;;  %v1912_v0 = vmul.f32 0.5, %v2608_v41 }
 0x528   : > { %2611 = vtanh.f32 %v1888_v61  ;;  %2298 = vmatmul.msk.bf16.vlgmr.msra.gmra.mxu2 %vm510_vm2, %v3132_v2  ;;  %v1913_v1 = vmul.f32 0.5, %v2610_v63 }
 0x529   : > { %2613 = vtanh.f32 %v1889_v43  ;;  %2299 = vmatmul.msk.bf16.vlgmr.msra.gmra.mxu3 %vm510_vm2, %v3132_v2  ;;  %v1928_v7 = vadd.f32 0.5, %v1912_v0 }
 0x52a   : > { %v1929_v9 = vadd.f32 0.5, %v1913_v1 }
 0x52e   : > { %v2612_v11 = vpop.eup %2611 }
 0x52f   : > { %v2614_v4 = vpop.eup %2613  ;;  %v1920_v6 = vmul.f32 0.5, %v2612_v11 }
 0x530   : > { %v1921_v39 = vmul.f32 0.5, %v2614_v4 }
 0x531   : > { %v1936_v49 = vadd.f32 0.5, %v1920_v6 }
 0x532   : > { %v1937_v10 = vadd.f32 0.5, %v1921_v39 }
 0x533   : > { %v1945_v12 = vpack.c.bf16 %v1936_v49, %v1928_v7 }
 0x534   : > { %v1946_v13 = vpack.c.bf16 %v1937_v10, %v1929_v9 }
 0x535   : > { %2042 = vmatpush.bf16.msrb.mxu2 %v1945_v12 }
 0x536   : > { %2055 = vmatpush.bf16.msrb.mxu3 %v1946_v13 }
 0x538   : > { %2302 = vmatmul.msk.bf16.vlgmr.msrb.gmra.mxu2 %vm510_vm2, %v3132_v2 }
 0x539   : > { %2303 = vmatmul.msk.bf16.vlgmr.msrb.gmra.mxu3 %vm510_vm2, %v3132_v2 }
 0x574   : > { %v1966_v14 = vpop.f32.mrf.mxu0 }
 0x575   : > { %v1979_v16 = vpop.f32.mrf.mxu1  ;;  %v1967_v17 = vadd.f32 %v1966_v14, %v1952_v5 }
 0x576   : > { %v1980_v26 = vadd.f32 %v1979_v16, %v1952_v5 }
 0x578   : > { %v2069_v18 = vrot.slane %v1980_v26, 7 }
 0x57a   : > { %v2076_v62 = vsel %vm281_vm0, %v1967_v17, %v2069_v18 }
 0x57c   : > { %v1968_v20 = vpop.f32.mrf.mxu0 }
 0x57d   : > { %v1981_v21 = vpop.f32.mrf.mxu1 }
 0x584   : > { %v2018_v55 = vpop.f32.mrf.mxu0 }
 0x585   : > { %v2031_v23 = vpop.f32.mrf.mxu1  ;;  %v2019_v32 = vadd.f32 %v2018_v55, %v1952_v5 }
 0x586   : > { %v2032_v33 = vadd.f32 %v2031_v23, %v1952_v5 }
 0x587   : > { %v2072_v25 = vrot.slane %v2019_v32, 4 }
 0x588   : > { %v2073_v40 = vrot.slane %v2032_v33, 3 }
 0x58a   : > { %v2082_v45 = vsel %vm2081_vm4, %v2072_v25, %v2073_v40 }
 0x58c   : > { %v2020_v24 = vpop.f32.mrf.mxu0 }
 0x58d   : > { %v2033_v27 = vpop.f32.mrf.mxu1 }
 0x5ab   : > { %v1992_v59 = vpop.f32.mrf.mxu2 }
 0x5ac   : > { %v2005_v28 = vpop.f32.mrf.mxu3  ;;  %v1993_v30 = vadd.f32 %v1992_v59, %v1952_v5 }
 0x5ad   : > { %v2006_v31 = vadd.f32 %v2005_v28, %v1952_v5 }
 0x5ae   : > { %v2070_v34 = vrot.slane %v1993_v30, 6 }
 0x5af   : > { %v2071_v35 = vrot.slane %v2006_v31, 5 }
 0x5b1   : > { %v2078_v22 = vsel %vm2077_vm3, %v2070_v34, %v2071_v35 }
 0x5b2   : > { %v2080_v46 = vsel %vm2079_vm6, %v2076_v62, %v2078_v22 }
 0x5b3   : > { %v1994_v2 = vpop.f32.mrf.mxu2 }
 0x5b4   : > { %v2007_v3 = vpop.f32.mrf.mxu3 }
 0x5bb   : > { %v2044_v8 = vpop.f32.mrf.mxu2 }
 0x5bc   : > { %v2045_v37 = vadd.f32 %v2044_v8, %v1952_v5  ;;  %v2057_v38 = vpop.f32.mrf.mxu3 }
 0x5bd   : > { %v2058_v36 = vadd.f32 %v2057_v38, %v1952_v5 }
 0x5be   : > { %v2074_v42 = vrot.slane %v2045_v37, 2 }
 0x5bf   : > { %v2075_v44 = vrot.slane %v2058_v36, 1 }
 0x5c1   : > { %v2084_v15 = vsel %vm2083_vm5, %v2074_v42, %v2075_v44 }
 0x5c2   : > { %v2086_v47 = vsel %vm2085_vm7, %v2082_v45, %v2084_v15 }
 0x5c3   : > { %v2046_v50 = vpop.f32.mrf.mxu2  ;;  %v2088_v51 = vsel %vm2087_vm8, %v2080_v46, %v2086_v47 }
 0x5c4   : > { %v2059_v52 = vpop.f32.mrf.mxu3  ;;  %2090 = vst [vmem:[%s218_s25] sm:$0xff] %v2088_v51 }
 0x5c5   : > { %2642 = shalt.err (!%p2639_p3)
}
 0x5c6   : > { %2316 = dma.vmem_to_hbm [thread:$0]  (%p2745_p5), %s2105_s26, 128, %s2107_s30, %s2092_s7  }
 0x5c7 PF: > { %p2322_p4 = scmp.ge.s32.totalorder %s2677_s21, 2  ;;  %s2118_s14 = sand.u32 1, %s2665_s18  }
 0x5c8   : > { %s2119_s15 = scalar_lea.sflag [#allocation3], %s2118_s14 }
 0x5c9   : > { %p2319_p7 = pnand %p2322_p4, %p2749_p6 }
 0x5cb   : > { %p2320_p8 = pneg %p2319_p7 }
 0x5cd   : > { %2660 = dma.done.wait (%p2320_p8), %s2119_s15, 128  }
 0x5ce   : > { %2662 = vsyncadd (%p2320_p8), %s2119_s15, 4294967168  ;;  %p15_p9 = scmp.ge.s32.totalorder %s2733_s24, 4   ;;  %s3208_s18 = smov %s2669_s19 }
 0x5cf   : > { %s3209_s19 = smov %s2673_s20  ;;  %s3210_s20 = smov %s2743_s27 }
 0x5d0   : > { %s3211_s21 = smov %s2733_s24  ;;  %17 = sbr.rel (!%p15_p9) target bundleno = 3 (0x3), region = 90 }
 0x5d5   :  { %2125 = vsyncpa [#allocation3], 1 }
 0x5d6   :  { %2127 = vsyncpa [#allocation3 + $0x1], 1 }

</bundles_post_ra>
